<compile_context>
chip_gen: v7x
topology: tpu7x:2x2x1
jax: 0.10.0
libtpu: 0.0.40
codegen_flags: <defaults>
</compile_context>

<pallas_src>
import functools

import jax
import jax.numpy as jnp
from jax.experimental import pallas as pl
from jax.experimental.pallas import tpu as pltpu

IMG_SHAPE = (1, 28, 28)
IN_FEAT = 1 * 28 * 28          # 784, kept unpadded (full-dim K block)
H1, H2, H3 = 512, 256, 128
W4T_ROWS = 8                   # final layer packed as (8, 128): row 0 real, rows 1..7 zero
DEFAULT_MAX_TB = 512           # batch-tile cap (multiple of 128)


def _round_up(n, m):
    return ((n + m - 1) // m) * m


def _cdiv(a, b):
    return (a + b - 1) // b


def _leaky_relu(x, slope=0.2):
    return jnp.where(x > 0, x, slope * x)


def discriminator_kernel(x_ref, w1_ref, b1_ref, w2_ref, b2_ref,
                         w3_ref, b3_ref, w4t_ref, b4_ref, o_ref):
    # x tile: (TB, 784) f32 straight from HBM; cast to bf16 in-kernel so the
    # wrapper never rewrites the activation tensor.
    x = x_ref[...].astype(jnp.bfloat16)

    h = jnp.dot(x, w1_ref[...], preferred_element_type=jnp.float32) + b1_ref[...]
    h = _leaky_relu(h)

    h = jnp.dot(h.astype(jnp.bfloat16), w2_ref[...],
                preferred_element_type=jnp.float32) + b2_ref[...]
    h = _leaky_relu(h)

    h = jnp.dot(h.astype(jnp.bfloat16), w3_ref[...],
                preferred_element_type=jnp.float32) + b3_ref[...]
    h = _leaky_relu(h)

    # Final Linear(128, 1), computed transposed so the single real output
    # column is lane-dense: (8,128) . (TB,128)^T -> (8, TB); only row 0 is real.
    lt = jax.lax.dot_general(
        w4t_ref[...], h.astype(jnp.bfloat16),
        dimension_numbers=(((1,), (1,)), ((), ())),
        preferred_element_type=jnp.float32)
    logits = lt[0:1, :] + b4_ref[...]                      # (1, TB) + (1, 1)

    # Exact sigmoid (tiny (1, TB) tensor; exp on the EUP).
    o_ref[...] = 1.0 / (1.0 + jnp.exp(-logits))


def prepare_params(params):
    """One-time weight prep: bf16 cast + pack the (128,1) final layer as (8,128).

    params: [(w1,b1),(w2,b2),(w3,b3),(w4,b4)], w stored (in_features, out_features),
    b stored (1, out_features).  Call once and reuse across forward calls.
    """
    (w1, b1), (w2, b2), (w3, b3), (w4, b4) = params
    w4t = jnp.zeros((W4T_ROWS, H3), jnp.float32).at[0, :].set(w4[:, 0])
    return (
        w1.astype(jnp.bfloat16), b1.astype(jnp.float32),
        w2.astype(jnp.bfloat16), b2.astype(jnp.float32),
        w3.astype(jnp.bfloat16), b3.astype(jnp.float32),
        w4t.astype(jnp.bfloat16), b4.reshape(1, 1).astype(jnp.float32),
    )


def _choose_batch_tile(B, max_tb=DEFAULT_MAX_TB):
    """Batch tile: multiple of 128 (<= max_tb), least batch padding, and >= 2
    grid steps whenever B allows (so v7x's two TensorCores both get work)."""
    if B <= 128:
        return _round_up(max(B, 1), 8)
    best_tb, best_key = None, None
    for tb in range(128, max_tb + 1, 128):
        steps = _cdiv(B, tb)
        if steps < 2:
            continue
        key = (steps * tb - B, -tb)       # least padding, then largest tile
        if best_key is None or key < best_key:
            best_key, best_tb = key, tb
    return best_tb if best_tb is not None else _round_up(B, 8)


@functools.partial(jax.jit, static_argnames=("max_tb",))
def discriminator_forward_prepared(img, prepared, *, max_tb=DEFAULT_MAX_TB):
    """img: (B, 1, 28, 28) float32.  Returns (B, 1) float32 probabilities."""
    B = img.shape[0]
    x = img.reshape(B, IN_FEAT)                      # row-major, == torch .view

    tb = _choose_batch_tile(B, max_tb)
    b_pad = _round_up(B, tb)
    if b_pad != B:
        x = jnp.pad(x, ((0, b_pad - B), (0, 0)))     # batch pad only, stays f32
    grid = (b_pad // tb,)

    w1, b1, w2, b2, w3, b3, w4t, b4 = prepared

    def resident(shape):
        # Same block every grid step -> weights/biases stay VMEM-resident.
        return pl.BlockSpec(shape, lambda i: (0, 0))

    in_specs = [
        pl.BlockSpec((tb, IN_FEAT), lambda i: (i, 0)),
        resident((IN_FEAT, H1)),  resident((1, H1)),
        resident((H1, H2)),       resident((1, H2)),
        resident((H2, H3)),       resident((1, H3)),
        resident((W4T_ROWS, H3)), resident((1, 1)),
    ]
    # Lane-dense transposed output: one f32 per row instead of a 128-wide pad.
    out_spec = pl.BlockSpec((1, tb), lambda i: (0, i))

    weight_bytes = 2 * (IN_FEAT * H1 + H1 * H2 + H2 * H3 + W4T_ROWS * H3)
    cost = pl.CostEstimate(
        flops=2 * b_pad * (IN_FEAT * H1 + H1 * H2 + H2 * H3 + W4T_ROWS * H3),
        transcendentals=b_pad,
        bytes_accessed=b_pad * IN_FEAT * 4 + weight_bytes
        + 4 * (H1 + H2 + H3 + 1) + b_pad * 4,
    )

    out = pl.pallas_call(
        discriminator_kernel,
        out_shape=jax.ShapeDtypeStruct((1, b_pad), jnp.float32),
        grid=grid,
        in_specs=in_specs,
        out_specs=out_spec,
        compiler_params=pltpu.CompilerParams(
            dimension_semantics=("parallel",),
            vmem_limit_bytes=32 << 20,
        ),
        cost_estimate=cost,
    )(x, w1, b1, w2, b2, w3, b3, w4t, b4)

    return out[0, :B].reshape(B, 1)


def discriminator_forward(img, params, *, max_tb=DEFAULT_MAX_TB):
    """Convenience wrapper: prep weights then run the jitted forward."""
    return discriminator_forward_prepared(img, prepare_params(params), max_tb=max_tb)


def init_params(key):
    """Deterministic init mirroring nn.Linear default: U(-1/sqrt(fan_in), +)."""
    sizes = [(IN_FEAT, H1), (H1, H2), (H2, H3), (H3, 1)]
    params = []
    for (fan_in, fan_out) in sizes:
        key, kw, kb = jax.random.split(key, 3)
        bound = 1.0 / jnp.sqrt(jnp.float32(fan_in))
        # Stored already transposed: (in_features, out_features).
        w = jax.random.uniform(kw, (fan_in, fan_out), jnp.float32, -bound, bound)
        b = jax.random.uniform(kb, (1, fan_out), jnp.float32, -bound, bound)
        params.append((w, b))
    return params


def reference_forward(img, params):
    """Plain-JAX reference using the same bf16-input / f32-accumulate path."""
    x = img.reshape(img.shape[0], -1)
    (w1, b1), (w2, b2), (w3, b3), (w4, b4) = params

    def dot16(a, w):
        return jnp.dot(a.astype(jnp.bfloat16), w.astype(jnp.bfloat16),
                       preferred_element_type=jnp.float32)

    h = _leaky_relu(dot16(x, w1) + b1)
    h = _leaky_relu(dot16(h, w2) + b2)
    h = _leaky_relu(dot16(h, w3) + b3)
    return jax.nn.sigmoid(dot16(h, w4) + b4)


if __name__ == "__main__":
    key = jax.random.PRNGKey(0)
    kp, kx = jax.random.split(key)

    params = init_params(kp)
    prepared = prepare_params(params)

    # Small smoke test (single tile).
    B = 8
    img = jax.random.normal(kx, (B,) + IMG_SHAPE, jnp.float32)
    out = jax.block_until_ready(discriminator_forward_prepared(img, prepared))
    ref = reference_forward(img, params)
    assert out.shape == (B, 1), out.shape
    assert jnp.allclose(out, ref, atol=2e-3, rtol=2e-3), (
        f"max abs diff {jnp.max(jnp.abs(out - ref))}"
    )

    # Multi-step grid + batch-padding path (300 -> 3 tiles of 128, megacore-shardable).
    B2 = 300
    img2 = jax.random.normal(jax.random.fold_in(kx, 1), (B2,) + IMG_SHAPE, jnp.float32)
    out2 = jax.block_until_ready(discriminator_forward_prepared(img2, prepared))
    ref2 = reference_forward(img2, params)
    assert out2.shape == (B2, 1), out2.shape
    assert jnp.allclose(out2, ref2, atol=2e-3, rtol=2e-3), (
        f"max abs diff {jnp.max(jnp.abs(out2 - ref2))}"
    )

    print("KERNEL_OK")
</pallas_src>

<mosaic_0001>
module attributes {stable_mosaic.version = 11 : i64} {
  func.func @discriminator_kernel(%arg0: i32, %arg1: memref<8x784xf32, #tpu.memory_space<vmem>>, %arg2: memref<784x512xbf16, #tpu.memory_space<vmem>>, %arg3: memref<1x512xf32, #tpu.memory_space<vmem>>, %arg4: memref<512x256xbf16, #tpu.memory_space<vmem>>, %arg5: memref<1x256xf32, #tpu.memory_space<vmem>>, %arg6: memref<256x128xbf16, #tpu.memory_space<vmem>>, %arg7: memref<1x128xf32, #tpu.memory_space<vmem>>, %arg8: memref<8x128xbf16, #tpu.memory_space<vmem>>, %arg9: memref<1x1xf32, #tpu.memory_space<vmem>>, %arg10: memref<1x8xf32, #tpu.memory_space<vmem>>) attributes {dimension_semantics = [#tpu.dimension_semantics<parallel>], iteration_bounds = array<i64: 1>, scalar_prefetch = 0 : i64, scratch_operands = 0 : i64, tpu.core_type = #tpu.core_type<tc>, window_params = [{transform_indices = @transform_0, window_bounds = array<i64: 8, 784>}, {pipeline_mode = #tpu.pipeline_mode<synchronous>, transform_indices = @transform_1, window_bounds = array<i64: 784, 512>}, {pipeline_mode = #tpu.pipeline_mode<synchronous>, transform_indices = @transform_2, window_bounds = array<i64: 1, 512>}, {pipeline_mode = #tpu.pipeline_mode<synchronous>, transform_indices = @transform_3, window_bounds = array<i64: 512, 256>}, {pipeline_mode = #tpu.pipeline_mode<synchronous>, transform_indices = @transform_4, window_bounds = array<i64: 1, 256>}, {pipeline_mode = #tpu.pipeline_mode<synchronous>, transform_indices = @transform_5, window_bounds = array<i64: 256, 128>}, {pipeline_mode = #tpu.pipeline_mode<synchronous>, transform_indices = @transform_6, window_bounds = array<i64: 1, 128>}, {pipeline_mode = #tpu.pipeline_mode<synchronous>, transform_indices = @transform_7, window_bounds = array<i64: 8, 128>}, {pipeline_mode = #tpu.pipeline_mode<synchronous>, transform_indices = @transform_8, window_bounds = array<i64: 1, 1>}, {transform_indices = @transform_9, window_bounds = array<i64: 1, 8>}]} {
    %c0 = arith.constant 0 : index
    %c0_0 = arith.constant 0 : index
    %0 = vector.load %arg1[%c0, %c0_0] : memref<8x784xf32, #tpu.memory_space<vmem>>, vector<8x784xf32>
    %1 = arith.truncf %0 : vector<8x784xf32> to vector<8x784xbf16>
    %c0_1 = arith.constant 0 : index
    %c0_2 = arith.constant 0 : index
    %2 = vector.load %arg2[%c0_1, %c0_2] : memref<784x512xbf16, #tpu.memory_space<vmem>>, vector<784x512xbf16>
    %cst = arith.constant dense<0.000000e+00> : vector<8x512xf32>
    %3 = tpu.matmul %1, %2, %cst {dimension_numbers = #tpu.dot_dimension_numbers<[1], [0], [0], [1], [0, 0, 1, 1], [], []>} : vector<8x784xbf16>, vector<784x512xbf16>, vector<8x512xf32> -> vector<8x512xf32>
    %c0_3 = arith.constant 0 : index
    %c0_4 = arith.constant 0 : index
    %4 = vector.load %arg3[%c0_3, %c0_4] : memref<1x512xf32, #tpu.memory_space<vmem>>, vector<1x512xf32>
    %5 = vector.broadcast %4 : vector<1x512xf32> to vector<8x512xf32>
    %6 = arith.addf %3, %5 : vector<8x512xf32>
    %cst_5 = arith.constant 0.000000e+00 : f32
    %7 = vector.broadcast %cst_5 : f32 to vector<8x512xf32>
    %8 = arith.cmpf ogt, %6, %7 : vector<8x512xf32>
    %cst_6 = arith.constant 2.000000e-01 : f32
    %9 = vector.broadcast %cst_6 : f32 to vector<8x512xf32>
    %10 = arith.mulf %9, %6 : vector<8x512xf32>
    %11 = arith.select %8, %6, %10 : vector<8x512xi1>, vector<8x512xf32>
    %12 = arith.truncf %11 : vector<8x512xf32> to vector<8x512xbf16>
    %c0_7 = arith.constant 0 : index
    %c0_8 = arith.constant 0 : index
    %13 = vector.load %arg4[%c0_7, %c0_8] : memref<512x256xbf16, #tpu.memory_space<vmem>>, vector<512x256xbf16>
    %cst_9 = arith.constant dense<0.000000e+00> : vector<8x256xf32>
    %14 = tpu.matmul %12, %13, %cst_9 {dimension_numbers = #tpu.dot_dimension_numbers<[1], [0], [0], [1], [0, 0, 1, 1], [], []>} : vector<8x512xbf16>, vector<512x256xbf16>, vector<8x256xf32> -> vector<8x256xf32>
    %c0_10 = arith.constant 0 : index
    %c0_11 = arith.constant 0 : index
    %15 = vector.load %arg5[%c0_10, %c0_11] : memref<1x256xf32, #tpu.memory_space<vmem>>, vector<1x256xf32>
    %16 = vector.broadcast %15 : vector<1x256xf32> to vector<8x256xf32>
    %17 = arith.addf %14, %16 : vector<8x256xf32>
    %cst_12 = arith.constant 0.000000e+00 : f32
    %18 = vector.broadcast %cst_12 : f32 to vector<8x256xf32>
    %19 = arith.cmpf ogt, %17, %18 : vector<8x256xf32>
    %cst_13 = arith.constant 2.000000e-01 : f32
    %20 = vector.broadcast %cst_13 : f32 to vector<8x256xf32>
    %21 = arith.mulf %20, %17 : vector<8x256xf32>
    %22 = arith.select %19, %17, %21 : vector<8x256xi1>, vector<8x256xf32>
    %23 = arith.truncf %22 : vector<8x256xf32> to vector<8x256xbf16>
    %c0_14 = arith.constant 0 : index
    %c0_15 = arith.constant 0 : index
    %24 = vector.load %arg6[%c0_14, %c0_15] : memref<256x128xbf16, #tpu.memory_space<vmem>>, vector<256x128xbf16>
    %cst_16 = arith.constant dense<0.000000e+00> : vector<8x128xf32>
    %25 = tpu.matmul %23, %24, %cst_16 {dimension_numbers = #tpu.dot_dimension_numbers<[1], [0], [0], [1], [0, 0, 1, 1], [], []>} : vector<8x256xbf16>, vector<256x128xbf16>, vector<8x128xf32> -> vector<8x128xf32>
    %c0_17 = arith.constant 0 : index
    %c0_18 = arith.constant 0 : index
    %26 = vector.load %arg7[%c0_17, %c0_18] : memref<1x128xf32, #tpu.memory_space<vmem>>, vector<1x128xf32>
    %27 = vector.broadcast %26 : vector<1x128xf32> to vector<8x128xf32>
    %28 = arith.addf %25, %27 : vector<8x128xf32>
    %cst_19 = arith.constant 0.000000e+00 : f32
    %29 = vector.broadcast %cst_19 : f32 to vector<8x128xf32>
    %30 = arith.cmpf ogt, %28, %29 : vector<8x128xf32>
    %cst_20 = arith.constant 2.000000e-01 : f32
    %31 = vector.broadcast %cst_20 : f32 to vector<8x128xf32>
    %32 = arith.mulf %31, %28 : vector<8x128xf32>
    %33 = arith.select %30, %28, %32 : vector<8x128xi1>, vector<8x128xf32>
    %c0_21 = arith.constant 0 : index
    %c0_22 = arith.constant 0 : index
    %34 = vector.load %arg8[%c0_21, %c0_22] : memref<8x128xbf16, #tpu.memory_space<vmem>>, vector<8x128xbf16>
    %35 = arith.truncf %33 : vector<8x128xf32> to vector<8x128xbf16>
    %cst_23 = arith.constant dense<0.000000e+00> : vector<8x8xf32>
    %36 = tpu.matmul %34, %35, %cst_23 {dimension_numbers = #tpu.dot_dimension_numbers<[1], [1], [0], [0], [0, 0, 1, 0], [], []>} : vector<8x128xbf16>, vector<8x128xbf16>, vector<8x8xf32> -> vector<8x8xf32>
    %37 = vector.extract_strided_slice %36 {offsets = [0, 0], sizes = [1, 8], strides = [1, 1]} : vector<8x8xf32> to vector<1x8xf32>
    %c0_24 = arith.constant 0 : index
    %c0_25 = arith.constant 0 : index
    %38 = vector.load %arg9[%c0_24, %c0_25] : memref<1x1xf32, #tpu.memory_space<vmem>>, vector<1x1xf32>
    %39 = vector.broadcast %38 : vector<1x1xf32> to vector<1x8xf32>
    %40 = arith.addf %37, %39 : vector<1x8xf32>
    %cst_26 = arith.constant 0.000000e+00 : f32
    %41 = vector.broadcast %cst_26 : f32 to vector<1x8xf32>
    %42 = arith.subf %41, %40 : vector<1x8xf32>
    %43 = math.exp %42 : vector<1x8xf32>
    %cst_27 = arith.constant 1.000000e+00 : f32
    %44 = vector.broadcast %cst_27 : f32 to vector<1x8xf32>
    %45 = arith.addf %44, %43 : vector<1x8xf32>
    %cst_28 = arith.constant 1.000000e+00 : f32
    %46 = vector.broadcast %cst_28 : f32 to vector<1x8xf32>
    %47 = arith.divf %46, %45 : vector<1x8xf32>
    %c0_29 = arith.constant 0 : index
    %c0_30 = arith.constant 0 : index
    %48 = vector.load %arg10[%c0_29, %c0_30] : memref<1x8xf32, #tpu.memory_space<vmem>>, vector<1x8xf32>
    tpu.vector_store %arg10[%c0_29, %c0_30], %47 {strides = array<i32>} : memref<1x8xf32, #tpu.memory_space<vmem>>, vector<1x8xf32>,
    return
  }
  func.func @transform_0(%arg0: i32) -> (i32, i32) {
    %c0_i32 = arith.constant 0 : i32
    %c0_i32_0 = arith.constant 0 : i32
    return %arg0, %c0_i32 : i32, i32
  }
  func.func @transform_1(%arg0: i32) -> (i32, i32) {
    %c0_i32 = arith.constant 0 : i32
    %c0_i32_0 = arith.constant 0 : i32
    %c0_i32_1 = arith.constant 0 : i32
    return %c0_i32, %c0_i32_0 : i32, i32
  }
  func.func @transform_2(%arg0: i32) -> (i32, i32) {
    %c0_i32 = arith.constant 0 : i32
    %c0_i32_0 = arith.constant 0 : i32
    %c0_i32_1 = arith.constant 0 : i32
    return %c0_i32, %c0_i32_0 : i32, i32
  }
  func.func @transform_3(%arg0: i32) -> (i32, i32) {
    %c0_i32 = arith.constant 0 : i32
    %c0_i32_0 = arith.constant 0 : i32
    %c0_i32_1 = arith.constant 0 : i32
    return %c0_i32, %c0_i32_0 : i32, i32
  }
  func.func @transform_4(%arg0: i32) -> (i32, i32) {
    %c0_i32 = arith.constant 0 : i32
    %c0_i32_0 = arith.constant 0 : i32
    %c0_i32_1 = arith.constant 0 : i32
    return %c0_i32, %c0_i32_0 : i32, i32
  }
  func.func @transform_5(%arg0: i32) -> (i32, i32) {
    %c0_i32 = arith.constant 0 : i32
    %c0_i32_0 = arith.constant 0 : i32
    %c0_i32_1 = arith.constant 0 : i32
    return %c0_i32, %c0_i32_0 : i32, i32
  }
  func.func @transform_6(%arg0: i32) -> (i32, i32) {
    %c0_i32 = arith.constant 0 : i32
    %c0_i32_0 = arith.constant 0 : i32
    %c0_i32_1 = arith.constant 0 : i32
    return %c0_i32, %c0_i32_0 : i32, i32
  }
  func.func @transform_7(%arg0: i32) -> (i32, i32) {
    %c0_i32 = arith.constant 0 : i32
    %c0_i32_0 = arith.constant 0 : i32
    %c0_i32_1 = arith.constant 0 : i32
    return %c0_i32, %c0_i32_0 : i32, i32
  }
  func.func @transform_8(%arg0: i32) -> (i32, i32) {
    %c0_i32 = arith.constant 0 : i32
    %c0_i32_0 = arith.constant 0 : i32
    %c0_i32_1 = arith.constant 0 : i32
    return %c0_i32, %c0_i32_0 : i32, i32
  }
  func.func @transform_9(%arg0: i32) -> (i32, i32) {
    %c0_i32 = arith.constant 0 : i32
    %c0_i32_0 = arith.constant 0 : i32
    return %c0_i32, %arg0 : i32, i32
  }
}

</mosaic_0001>

<bundles_post_ra>
// kernel: discriminator_forward_prepared.1
= control target key start
LH: loop header
LB: loop body
LE: loop exit
PB: predicated region body
PF: predicated region fallthrough
CT: control target
= control target key end

     0   :  { %s3566_s0 = inlined_call_operand.vmem [shape: f32[8,784], index: 0, kind: input, shape index: {}]   ;;  %s3567_s1 = inlined_call_operand.hbm [shape: bf16[784,512], index: 1, kind: input, shape index: {}]   ;;  %s3568_s2 = inlined_call_operand.vmem [shape: f32[1,512], index: 2, kind: input, shape index: {}]   ;;  %s3569_s3 = inlined_call_operand.vmem [shape: bf16[512,256], index: 3, kind: input, shape index: {}]   ;;  %s3570_s4 = inlined_call_operand.vmem [shape: f32[1,256], index: 4, kind: input, shape index: {}]   ;;  %s3571_s5 = inlined_call_operand.vmem [shape: bf16[256,128], index: 5, kind: input, shape index: {}]   ;;  %s3572_s6 = inlined_call_operand.vmem [shape: f32[1,128], index: 6, kind: input, shape index: {}]   ;;  %s3573_s7 = inlined_call_operand.vmem [shape: bf16[8,128], index: 7, kind: input, shape index: {}]   ;;  %s3574_s8 = inlined_call_operand.<no memory space> [shape: f32[1,1], index: 8, kind: input, shape index: {}]   ;;  %s3575_s9 = inlined_call_operand.hbm [shape: f32[1,8], index: 9, kind: output, shape index: {}]  }
   0x1   :  { %v14_v0 = vstv %s3574_s8 }
   0x2   :  { %15 = vst [vmem:[#allocation2] sm:$0x1] %v14_v0 }
   0x3   :  { %16 = vsyncpa [#allocation4], 0 }
   0x4   :  { %17 = vsyncpa [#allocation5], 0  ;;  %s3155_s11 = smov [#allocation3]   ;;  %s3107_s15 = scalar_lea.hbm %s3567_s1, 25088 }
   0x5   :  { %s25_s12 = sshll.u32 %s3155_s11, 4  ;;  %p3108_p0 = scmp.ne.s32.totalorder %s3567_s1, %s3107_s15  ;;  %s26_s12 = int_to_ptr.vmem [resolvable:$true] %s25_s12 }
   0x6   :  { %p3111_p1 = scmp.lt.u32.totalorder %s3107_s15, %s3567_s1 }
   0x8   :  { %p3113_p2 = pnand %p3111_p1, %p3108_p0 }
   0xa   :  { %3116 = shalt.err (!%p3113_p2)
}
   0xb   :  { %s3117_s8 = scalar_lea.vmem %s26_s12, 25088  ;;  %p3122_p4 = scmp.lt.s32.totalorder %s26_s12, %s26_s12 }
   0xc   :  { %p3118_p3 = scmp.ne.s32.totalorder %s26_s12, %s3117_s8  ;;  %p3123_p5 = scmp.lt.s32.totalorder %s3117_s8, %s3117_s8 }
   0xe   :  { %p3124_p6 = por %p3123_p5, %p3122_p4 }
  0x10   :  { %p3125_p7 = pnand %p3124_p6, %p3118_p3 }
  0x12   :  { %3128 = shalt.err (!%p3125_p7)
}
  0x13   :  { %s3156_s20 = smov 256   ;;  %s3157_s21 = smov 16  }
  0x14   :  { %31 = dma.hbm_to_vmem [thread:$0]  %s3567_s1, 25088, %s26_s12, [#allocation4], %s3156_s20, %s3156_s20, %s3157_s21  }
  0x15   :  { %3151 = dma.done.wait [#allocation4], 25088  }
  0x16   :  { %3152 = vsyncadd [#allocation4], 4294942208  ;;  %v2697_v1 = vld [vmem:[#allocation3 + $0x4] ss:$16 sps:$4 sm:$0xff]   ;;  %v2701_v3 = vld [vmem:[#allocation3] ss:$16 sps:$4 sm:$0xff]  }
  0x17   :  { %v2699_v2 = vld [vmem:[#allocation3 + $0x204] ss:$16 sps:$4 sm:$0xff]   ;;  %1266 = vmatprep.subr.bf16.mxu1 %v2697_v1  ;;  %v2702_v4 = vld [vmem:[#allocation3 + $0x200] ss:$16 sps:$4 sm:$0xff]   ;;  %v3158_v19 = vmov 0   ;;  %vm1262_vm0 = vcmask 130048  }
  0x18   :  { %1307 = vmatprep.subr.bf16.mxu0 %v2699_v2  ;;  %v2703_v5 = vld [vmem:[#allocation3 + $0x24] ss:$16 sps:$4 sm:$0xff]   ;;  %1267 = vmatpush1.bf16.msra.mxu1 %v2701_v3  ;;  %v2707_v7 = vld [vmem:[#allocation3 + $0x20] ss:$16 sps:$4 sm:$0xff]   ;;  %vm3160_vm7 = vmmov 0   ;;  %vm2333_vm9 = vcmask 57344  }
  0x19   :  { %1308 = vmatpush1.bf16.msra.mxu0 %v2702_v4  ;;  %v2705_v6 = vld [vmem:[#allocation3 + $0x224] ss:$16 sps:$4 sm:$0xff]   ;;  %1268 = vmatprep.subr.bf16.mxu1 %v2703_v5  ;;  %v2708_v8 = vld [vmem:[#allocation3 + $0x220] ss:$16 sps:$4 sm:$0xff]  }
  0x1a   :  { %1309 = vmatprep.subr.bf16.mxu0 %v2705_v6  ;;  %v2709_v9 = vld [vmem:[#allocation3 + $0x44] ss:$16 sps:$4 sm:$0xff]   ;;  %v2713_v11 = vld [vmem:[#allocation3 + $0x40] ss:$16 sps:$4 sm:$0xff]   ;;  %2696 = vset.pattern.permute.xlu0 %v3158_v19 }
  0x1b   :  { %v2711_v10 = vld [vmem:[#allocation3 + $0x244] ss:$16 sps:$4 sm:$0xff]   ;;  %v2714_v12 = vld [vmem:[#allocation3 + $0x240] ss:$16 sps:$4 sm:$0xff]  }
  0x1c   :  { %1269 = vmatpush1.bf16.msra.mxu1 %v2707_v7  ;;  %v2715_v13 = vld [vmem:[#allocation3 + $0x64] ss:$16 sps:$4 sm:$0xff]   ;;  %v2719_v15 = vld [vmem:[#allocation3 + $0x60] ss:$16 sps:$4 sm:$0xff]  }
  0x1d   :  { %1310 = vmatpush1.bf16.msra.mxu0 %v2708_v8  ;;  %1270 = vmatprep.subr.bf16.mxu1 %v2709_v9  ;;  %v2717_v14 = vld [vmem:[#allocation3 + $0x264] ss:$16 sps:$4 sm:$0xff]   ;;  %v2720_v16 = vld [vmem:[#allocation3 + $0x260] ss:$16 sps:$4 sm:$0xff]   ;;  %v2798_v9 = vld [vmem:[#allocation3 + $0xc] ss:$16 sps:$4 sm:$0xff]  }
  0x1e   :  { %1311 = vmatprep.subr.bf16.mxu0 %v2711_v10  ;;  %v2721_v17 = vld [vmem:[#allocation3 + $0x84] ss:$16 sps:$4 sm:$0xff]   ;;  %v2725_v20 = vld [vmem:[#allocation3 + $0x80] ss:$16 sps:$4 sm:$0xff]  }
  0x1f   :  { %v2723_v18 = vld [vmem:[#allocation3 + $0x284] ss:$16 sps:$4 sm:$0xff]   ;;  %v2726_v21 = vld [vmem:[#allocation3 + $0x280] ss:$16 sps:$4 sm:$0xff]  }
  0x20   :  { %1271 = vmatpush1.bf16.msra.mxu1 %v2713_v11  ;;  %v2727_v22 = vld [vmem:[#allocation3 + $0xa4] ss:$16 sps:$4 sm:$0xff]   ;;  %v2731_v24 = vld [vmem:[#allocation3 + $0xa0] ss:$16 sps:$4 sm:$0xff]  }
  0x21   :  { %1312 = vmatpush1.bf16.msra.mxu0 %v2714_v12  ;;  %1272 = vmatprep.subr.bf16.mxu1 %v2715_v13  ;;  %v2729_v23 = vld [vmem:[#allocation3 + $0x2a4] ss:$16 sps:$4 sm:$0xff]   ;;  %v2732_v25 = vld [vmem:[#allocation3 + $0x2a0] ss:$16 sps:$4 sm:$0xff]   ;;  %v2796_v12 = vld [vmem:[#allocation3 + $0x8] ss:$16 sps:$4 sm:$0xff]  }
  0x22   :  { %1313 = vmatprep.subr.bf16.mxu0 %v2717_v14  ;;  %v2733_v26 = vld [vmem:[#allocation3 + $0xc4] ss:$16 sps:$4 sm:$0xff]   ;;  %v2737_v28 = vld [vmem:[#allocation3 + $0xc0] ss:$16 sps:$4 sm:$0xff]  }
  0x23   :  { %v2735_v27 = vld [vmem:[#allocation3 + $0x2c4] ss:$16 sps:$4 sm:$0xff]   ;;  %v2738_v29 = vld [vmem:[#allocation3 + $0x2c0] ss:$16 sps:$4 sm:$0xff]  }
  0x24   :  { %1273 = vmatpush1.bf16.msra.mxu1 %v2719_v15  ;;  %v2739_v30 = vld [vmem:[#allocation3 + $0xe4] ss:$16 sps:$4 sm:$0xff]   ;;  %v2743_v32 = vld [vmem:[#allocation3 + $0xe0] ss:$16 sps:$4 sm:$0xff]   ;;  %v2804_v15 = vld [vmem:[#allocation3 + $0x2c] ss:$16 sps:$4 sm:$0xff]  }
  0x25   :  { %1314 = vmatpush1.bf16.msra.mxu0 %v2720_v16  ;;  %1274 = vmatprep.subr.bf16.mxu1 %v2721_v17  ;;  %v2741_v31 = vld [vmem:[#allocation3 + $0x2e4] ss:$16 sps:$4 sm:$0xff]   ;;  %v2744_v33 = vld [vmem:[#allocation3 + $0x2e0] ss:$16 sps:$4 sm:$0xff]   ;;  %v2802_v17 = vld [vmem:[#allocation3 + $0x28] ss:$16 sps:$4 sm:$0xff]  }
  0x26   :  { %1315 = vmatprep.subr.bf16.mxu0 %v2723_v18  ;;  %v2745_v34 = vld [vmem:[#allocation3 + $0x104] ss:$16 sps:$4 sm:$0xff]   ;;  %v2749_v36 = vld [vmem:[#allocation3 + $0x100] ss:$16 sps:$4 sm:$0xff]  }
  0x27   :  { %v2747_v35 = vld [vmem:[#allocation3 + $0x304] ss:$16 sps:$4 sm:$0xff]   ;;  %v2750_v37 = vld [vmem:[#allocation3 + $0x300] ss:$16 sps:$4 sm:$0xff]  }
  0x28   :  { %1275 = vmatpush1.bf16.msra.mxu1 %v2725_v20  ;;  %v2751_v38 = vld [vmem:[#allocation3 + $0x124] ss:$16 sps:$4 sm:$0xff]   ;;  %v2755_v40 = vld [vmem:[#allocation3 + $0x120] ss:$16 sps:$4 sm:$0xff]   ;;  %v2810_v20 = vld [vmem:[#allocation3 + $0x4c] ss:$16 sps:$4 sm:$0xff]  }
  0x29   :  { %1316 = vmatpush1.bf16.msra.mxu0 %v2726_v21  ;;  %1276 = vmatprep.subr.bf16.mxu1 %v2727_v22  ;;  %v2753_v39 = vld [vmem:[#allocation3 + $0x324] ss:$16 sps:$4 sm:$0xff]   ;;  %v2756_v41 = vld [vmem:[#allocation3 + $0x320] ss:$16 sps:$4 sm:$0xff]   ;;  %v2808_v22 = vld [vmem:[#allocation3 + $0x48] ss:$16 sps:$4 sm:$0xff]  }
  0x2a   :  { %1317 = vmatprep.subr.bf16.mxu0 %v2729_v23  ;;  %v2757_v42 = vld [vmem:[#allocation3 + $0x144] ss:$16 sps:$4 sm:$0xff]   ;;  %v2761_v44 = vld [vmem:[#allocation3 + $0x140] ss:$16 sps:$4 sm:$0xff]  }
  0x2b   :  { %v2759_v43 = vld [vmem:[#allocation3 + $0x344] ss:$16 sps:$4 sm:$0xff]   ;;  %v2762_v45 = vld [vmem:[#allocation3 + $0x340] ss:$16 sps:$4 sm:$0xff]  }
  0x2c   :  { %1277 = vmatpush1.bf16.msra.mxu1 %v2731_v24  ;;  %v2763_v46 = vld [vmem:[#allocation3 + $0x164] ss:$16 sps:$4 sm:$0xff]   ;;  %v2767_v49 = vld [vmem:[#allocation3 + $0x160] ss:$16 sps:$4 sm:$0xff]   ;;  %v2816_v24 = vld [vmem:[#allocation3 + $0x6c] ss:$16 sps:$4 sm:$0xff]  }
  0x2d   :  { %1318 = vmatpush1.bf16.msra.mxu0 %v2732_v25  ;;  %1278 = vmatprep.subr.bf16.mxu1 %v2733_v26  ;;  %v2765_v47 = vld [vmem:[#allocation3 + $0x364] ss:$16 sps:$4 sm:$0xff]   ;;  %v2768_v52 = vld [vmem:[#allocation3 + $0x360] ss:$16 sps:$4 sm:$0xff]   ;;  %v2814_v26 = vld [vmem:[#allocation3 + $0x68] ss:$16 sps:$4 sm:$0xff]  }
  0x2e   :  { %1319 = vmatprep.subr.bf16.mxu0 %v2735_v27  ;;  %v51_v48 = vld [vmem:[%s3566_s0 + $0x8] sm:$0xff]  ;;  %v53_v51 = vld [vmem:[%s3566_s0 + $0x18] sm:$0xff]  ;;  %v2773_v56 = vld [vmem:[#allocation3 + $0x180] ss:$16 sps:$4 sm:$0xff]  }
  0x2f   :  { %v3231_v50 = vpack.c.bf16 %v51_v48, %v51_v48  ;;  %v2769_v53 = vld [vmem:[#allocation3 + $0x184] ss:$16 sps:$4 sm:$0xff]   ;;  %v3236_v54 = vpack.c.bf16 %v53_v51, %v53_v51  ;;  %v2774_v57 = vld [vmem:[#allocation3 + $0x380] ss:$16 sps:$4 sm:$0xff]   ;;  %v2844_v48 = vld [vmem:[#allocation3 + $0x108] ss:$16 sps:$4 sm:$0xff]  }
  0x30   :  { %1279 = vmatpush1.bf16.msra.mxu1 %v2737_v28  ;;  %v2771_v55 = vld [vmem:[#allocation3 + $0x384] ss:$16 sps:$4 sm:$0xff]   ;;  %v2779_v60 = vld [vmem:[#allocation3 + $0x1a0] ss:$16 sps:$4 sm:$0xff]   ;;  %v2822_v28 = vld [vmem:[#allocation3 + $0x8c] ss:$16 sps:$4 sm:$0xff]  }
  0x31   :  { %1320 = vmatpush1.bf16.msra.mxu0 %v2738_v29  ;;  %1280 = vmatprep.subr.bf16.mxu1 %v2739_v30  ;;  %v2775_v58 = vld [vmem:[#allocation3 + $0x1a4] ss:$16 sps:$4 sm:$0xff]   ;;  %v2780_v61 = vld [vmem:[#allocation3 + $0x3a0] ss:$16 sps:$4 sm:$0xff]   ;;  %v2820_v30 = vld [vmem:[#allocation3 + $0x88] ss:$16 sps:$4 sm:$0xff]  }
  0x32   :  { %1321 = vmatprep.subr.bf16.mxu0 %v2741_v31  ;;  %1298 = vmatprep.mubr.bf16.mxu1 %v3231_v50  ;;  %v2777_v59 = vld [vmem:[#allocation3 + $0x3a4] ss:$16 sps:$4 sm:$0xff]   ;;  %v2785_v0 = vld [vmem:[#allocation3 + $0x1c0] ss:$16 sps:$4 sm:$0xff]  }
  0x33   :  { %1339 = vmatprep.mubr.bf16.mxu0 %v3236_v54  ;;  %v2781_v62 = vld [vmem:[#allocation3 + $0x1c4] ss:$16 sps:$4 sm:$0xff]   ;;  %v2786_v1 = vld [vmem:[#allocation3 + $0x3c0] ss:$16 sps:$4 sm:$0xff]  }
  0x34   :  { %1281 = vmatpush1.bf16.msra.mxu1 %v2743_v32  ;;  %v2783_v63 = vld [vmem:[#allocation3 + $0x3c4] ss:$16 sps:$4 sm:$0xff]   ;;  %v2791_v4 = vld [vmem:[#allocation3 + $0x1e0] ss:$16 sps:$4 sm:$0xff]   ;;  %v2828_v32 = vld [vmem:[#allocation3 + $0xac] ss:$16 sps:$4 sm:$0xff]  }
  0x35   :  { %1322 = vmatpush1.bf16.msra.mxu0 %v2744_v33  ;;  %1282 = vmatprep.subr.bf16.mxu1 %v2745_v34  ;;  %v2787_v2 = vld [vmem:[#allocation3 + $0x1e4] ss:$16 sps:$4 sm:$0xff]   ;;  %v2792_v5 = vld [vmem:[#allocation3 + $0x3e0] ss:$16 sps:$4 sm:$0xff]   ;;  %v2826_v34 = vld [vmem:[#allocation3 + $0xa8] ss:$16 sps:$4 sm:$0xff]  }
  0x36   :  { %1323 = vmatprep.subr.bf16.mxu0 %v2747_v35  ;;  %v2789_v3 = vld [vmem:[#allocation3 + $0x3e4] ss:$16 sps:$4 sm:$0xff]   ;;  %v2793_v11 = vld [vmem:[#allocation3 + $0x400] ss:$16 sps:$4 sm:$0xff]  }
  0x37   :  { %v50_v6 = vld [vmem:[%s3566_s0] sm:$0xff]  ;;  %v52_v8 = vld [vmem:[%s3566_s0 + $0x10] sm:$0xff] }
  0x38   :  { %1283 = vmatpush1.bf16.msra.mxu1 %v2749_v36  ;;  %v2795_v7 = vld [vmem:[#allocation3 + $0x404] ss:$16 sps:$4 sm:$0xff]   ;;  %v3246_v10 = vpack.c.bf16 %v50_v6, %v50_v6  ;;  %v3248_v13 = vpack.c.bf16 %v52_v8, %v52_v8  ;;  %v2799_v16 = vld [vmem:[#allocation3 + $0x420] ss:$16 sps:$4 sm:$0xff]   ;;  %v2834_v36 = vld [vmem:[#allocation3 + $0xcc] ss:$16 sps:$4 sm:$0xff]  }
  0x39   :  { %1324 = vmatpush1.bf16.msra.mxu0 %v2750_v37  ;;  %1284 = vmatprep.subr.bf16.mxu1 %v2751_v38  ;;  %v2801_v14 = vld [vmem:[#allocation3 + $0x424] ss:$16 sps:$4 sm:$0xff]   ;;  %v2805_v21 = vld [vmem:[#allocation3 + $0x440] ss:$16 sps:$4 sm:$0xff]  }
  0x3a   :  { %1325 = vmatprep.subr.bf16.mxu0 %v2753_v39  ;;  %v2807_v18 = vld [vmem:[#allocation3 + $0x444] ss:$16 sps:$4 sm:$0xff]   ;;  %v2811_v25 = vld [vmem:[#allocation3 + $0x460] ss:$16 sps:$4 sm:$0xff]  }
  0x3b   :  { %v2813_v23 = vld [vmem:[#allocation3 + $0x464] ss:$16 sps:$4 sm:$0xff]   ;;  %v2817_v29 = vld [vmem:[#allocation3 + $0x480] ss:$16 sps:$4 sm:$0xff]  }
  0x3c   :  { %1285 = vmatpush1.bf16.msra.mxu1 %v2755_v40  ;;  %v2819_v27 = vld [vmem:[#allocation3 + $0x484] ss:$16 sps:$4 sm:$0xff]   ;;  %v2823_v33 = vld [vmem:[#allocation3 + $0x4a0] ss:$16 sps:$4 sm:$0xff]   ;;  %v2832_v40 = vld [vmem:[#allocation3 + $0xc8] ss:$16 sps:$4 sm:$0xff]  }
  0x3d   :  { %1326 = vmatpush1.bf16.msra.mxu0 %v2756_v41  ;;  %1286 = vmatprep.subr.bf16.mxu1 %v2757_v42  ;;  %v2825_v31 = vld [vmem:[#allocation3 + $0x4a4] ss:$16 sps:$4 sm:$0xff]   ;;  %v2829_v39 = vld [vmem:[#allocation3 + $0x4c0] ss:$16 sps:$4 sm:$0xff]   ;;  %v2840_v42 = vld [vmem:[#allocation3 + $0xec] ss:$16 sps:$4 sm:$0xff]  }
  0x3e   :  { %1327 = vmatprep.subr.bf16.mxu0 %v2759_v43  ;;  %v2831_v35 = vld [vmem:[#allocation3 + $0x4c4] ss:$16 sps:$4 sm:$0xff]   ;;  %v2835_v43 = vld [vmem:[#allocation3 + $0x4e0] ss:$16 sps:$4 sm:$0xff]  }
  0x3f   :  { %v55_v37 = vld [vmem:[%s3566_s0 + $0x28] sm:$0xff]  ;;  %v2847_v51 = vld [vmem:[#allocation3 + $0x520] ss:$16 sps:$4 sm:$0xff]  }
  0x40   :  { %1287 = vmatpush1.bf16.msra.mxu1 %v2761_v44  ;;  %v3256_v38 = vpack.c.bf16 %v55_v37, %v55_v37  ;;  %v2837_v41 = vld [vmem:[#allocation3 + $0x4e4] ss:$16 sps:$4 sm:$0xff]   ;;  %v2838_v44 = vld [vmem:[#allocation3 + $0xe8] ss:$16 sps:$4 sm:$0xff]   ;;  %v2877_v8 = vld [vmem:[#allocation3 + $0x5c0] ss:$16 sps:$4 sm:$0xff]  }
  0x41   :  { %1328 = vmatpush1.bf16.msra.mxu0 %v2762_v45  ;;  %1288 = vmatprep.subr.bf16.mxu1 %v2763_v46  ;;  %v2843_v45 = vld [vmem:[#allocation3 + $0x504] ss:$16 sps:$4 sm:$0xff]   ;;  %v2846_v46 = vld [vmem:[#allocation3 + $0x10c] ss:$16 sps:$4 sm:$0xff]  }
  0x42   :  { %1329 = vmatprep.subr.bf16.mxu0 %v2765_v47  ;;  %v2841_v47 = vld [vmem:[#allocation3 + $0x500] ss:$16 sps:$4 sm:$0xff]   ;;  %v2879_v6 = vld [vmem:[#allocation3 + $0x5c4] ss:$16 sps:$4 sm:$0xff]   ;;  %v2915_v37 = vld [vmem:[#allocation3 + $0x2ec] ss:$16 sps:$4 sm:$0xff]  }
  0x44   :  { %1289 = vmatpush1.bf16.msra.mxu1 %v2767_v49  ;;  %v2849_v49 = vld [vmem:[#allocation3 + $0x524] ss:$16 sps:$4 sm:$0xff]  }
  0x45   :  { %1330 = vmatpush1.bf16.msra.mxu0 %v2768_v52  ;;  %1290 = vmatprep.subr.bf16.mxu1 %v2769_v53  ;;  %v2850_v52 = vld [vmem:[#allocation3 + $0x128] ss:$16 sps:$4 sm:$0xff]   ;;  %v2855_v53 = vld [vmem:[#allocation3 + $0x544] ss:$16 sps:$4 sm:$0xff]  }
  0x46   :  { %1331 = vmatprep.subr.bf16.mxu0 %v2771_v55  ;;  %v2858_v55 = vld [vmem:[#allocation3 + $0x14c] ss:$16 sps:$4 sm:$0xff]  }
  0x48   :  { %1291 = vmatpush1.bf16.msra.mxu1 %v2773_v56  ;;  %v2853_v56 = vld [vmem:[#allocation3 + $0x540] ss:$16 sps:$4 sm:$0xff]  }
  0x49   :  { %1332 = vmatpush1.bf16.msra.mxu0 %v2774_v57  ;;  %1292 = vmatprep.subr.bf16.mxu1 %v2775_v58  ;;  %v2856_v57 = vld [vmem:[#allocation3 + $0x148] ss:$16 sps:$4 sm:$0xff]   ;;  %v2861_v58 = vld [vmem:[#allocation3 + $0x564] ss:$16 sps:$4 sm:$0xff]  }
  0x4a   :  { %1333 = vmatprep.subr.bf16.mxu0 %v2777_v59  ;;  %v2864_v59 = vld [vmem:[#allocation3 + $0x16c] ss:$16 sps:$4 sm:$0xff]  }
  0x4c   :  { %1293 = vmatpush1.bf16.msra.mxu1 %v2779_v60  ;;  %v2859_v60 = vld [vmem:[#allocation3 + $0x560] ss:$16 sps:$4 sm:$0xff]  }
  0x4d   :  { %1334 = vmatpush1.bf16.msra.mxu0 %v2780_v61  ;;  %1294 = vmatprep.subr.bf16.mxu1 %v2781_v62  ;;  %v2862_v61 = vld [vmem:[#allocation3 + $0x168] ss:$16 sps:$4 sm:$0xff]   ;;  %v2867_v62 = vld [vmem:[#allocation3 + $0x584] ss:$16 sps:$4 sm:$0xff]  }
  0x4e   :  { %1335 = vmatprep.subr.bf16.mxu0 %v2783_v63  ;;  %v2870_v63 = vld [vmem:[#allocation3 + $0x18c] ss:$16 sps:$4 sm:$0xff]  }
  0x50   :  { %1295 = vmatpush1.bf16.msra.mxu1 %v2785_v0  ;;  %v2865_v0 = vld [vmem:[#allocation3 + $0x580] ss:$16 sps:$4 sm:$0xff]  }
  0x51   :  { %1336 = vmatpush1.bf16.msra.mxu0 %v2786_v1  ;;  %1296 = vmatprep.subr.bf16.mxu1 %v2787_v2  ;;  %v2868_v1 = vld [vmem:[#allocation3 + $0x188] ss:$16 sps:$4 sm:$0xff]   ;;  %v2873_v2 = vld [vmem:[#allocation3 + $0x5a4] ss:$16 sps:$4 sm:$0xff]  }
  0x52   :  { %1337 = vmatprep.subr.bf16.mxu0 %v2789_v3  ;;  %v2876_v3 = vld [vmem:[#allocation3 + $0x1ac] ss:$16 sps:$4 sm:$0xff]  }
  0x54   :  { %1297 = vmatpush1.bf16.msra.mxu1 %v2791_v4  ;;  %v2871_v4 = vld [vmem:[#allocation3 + $0x5a0] ss:$16 sps:$4 sm:$0xff]  }
  0x55   :  { %1338 = vmatpush1.bf16.msra.mxu0 %v2792_v5  ;;  %1430 = vmatprep.subr.bf16.mxu1 %v2798_v9  ;;  %v2874_v5 = vld [vmem:[#allocation3 + $0x1a8] ss:$16 sps:$4 sm:$0xff]  }
  0x56   :  { %1348 = vmatprep.subr.bf16.mxu0 %v2795_v7  ;;  %v2882_v7 = vld [vmem:[#allocation3 + $0x1cc] ss:$16 sps:$4 sm:$0xff]   ;;  %v2880_v9 = vld [vmem:[#allocation3 + $0x1c8] ss:$16 sps:$4 sm:$0xff]  }
  0x57   :  { %1299 = vmatmul.mubr.bf16.vlgmr.msra.gmra.mrb[0].mxu1 %v3246_v10 }
  0x58   :  { %1340 = vmatmul.mubr.bf16.vlgmr.msra.gmra.mrb[0].mxu0 %v3248_v13  ;;  %1431 = vmatpush1.bf16.msra.mxu1 %v2796_v12  ;;  %v2888_v12 = vld [vmem:[#allocation3 + $0x1ec] ss:$16 sps:$4 sm:$0xff]  }
  0x59   :  { %1349 = vmatpush1.bf16.msra.mxu0 %v2793_v11  ;;  %1432 = vmatprep.subr.bf16.mxu1 %v2804_v15  ;;  %v2885_v11 = vld [vmem:[#allocation3 + $0x5e4] ss:$16 sps:$4 sm:$0xff]   ;;  %v2886_v15 = vld [vmem:[#allocation3 + $0x1e8] ss:$16 sps:$4 sm:$0xff]  }
  0x5a   :  { %1350 = vmatprep.subr.bf16.mxu0 %v2801_v14  ;;  %1462 = vmatprep.mubr.bf16.mxu1 %v3231_v50  ;;  %v2852_v50 = vld [vmem:[#allocation3 + $0x12c] ss:$16 sps:$4 sm:$0xff]   ;;  %v2883_v14 = vld [vmem:[#allocation3 + $0x5e0] ss:$16 sps:$4 sm:$0xff]  }
  0x5b   :  { %1380 = vmatprep.mubr.bf16.mxu0 %v3256_v38 }
  0x5c   :  { %1433 = vmatpush1.bf16.msra.mxu1 %v2802_v17  ;;  %v2891_v17 = vld [vmem:[#allocation3 + $0x20c] ss:$16 sps:$4 sm:$0xff]  }
  0x5d   :  { %1351 = vmatpush1.bf16.msra.mxu0 %v2799_v16  ;;  %1434 = vmatprep.subr.bf16.mxu1 %v2810_v20  ;;  %v54_v16 = vld [vmem:[%s3566_s0 + $0x20] sm:$0xff] }
  0x5e   :  { %1352 = vmatprep.subr.bf16.mxu0 %v2807_v18  ;;  %v2897_v18 = vld [vmem:[#allocation3 + $0x604] ss:$16 sps:$4 sm:$0xff]   ;;  %v3262_v20 = vpack.c.bf16 %v54_v16, %v54_v16  ;;  %v2940_v16 = vld [vmem:[#allocation3 + $0x408] ss:$16 sps:$4 sm:$0xff]  }
  0x60   :  { %1435 = vmatpush1.bf16.msra.mxu1 %v2808_v22  ;;  %v2895_v22 = vld [vmem:[#allocation3 + $0x600] ss:$16 sps:$4 sm:$0xff]  }
  0x61   :  { %1353 = vmatpush1.bf16.msra.mxu0 %v2805_v21  ;;  %1436 = vmatprep.subr.bf16.mxu1 %v2816_v24  ;;  %v2889_v21 = vld [vmem:[#allocation3 + $0x208] ss:$16 sps:$4 sm:$0xff]   ;;  %v2987_v24 = vld [vmem:[#allocation3 + $0x60c] ss:$16 sps:$4 sm:$0xff]  }
  0x62   :  { %1354 = vmatprep.subr.bf16.mxu0 %v2813_v23  ;;  %v2894_v23 = vld [vmem:[#allocation3 + $0x22c] ss:$16 sps:$4 sm:$0xff]  }
  0x64   :  { %1437 = vmatpush1.bf16.msra.mxu1 %v2814_v26  ;;  %v2900_v26 = vld [vmem:[#allocation3 + $0x24c] ss:$16 sps:$4 sm:$0xff]  }
  0x65   :  { %1355 = vmatpush1.bf16.msra.mxu0 %v2811_v25  ;;  %1438 = vmatprep.subr.bf16.mxu1 %v2822_v28  ;;  %v2892_v25 = vld [vmem:[#allocation3 + $0x228] ss:$16 sps:$4 sm:$0xff]   ;;  %v56_v28 = vld [vmem:[%s3566_s0 + $0x30] sm:$0xff] }
  0x66   :  { %1356 = vmatprep.subr.bf16.mxu0 %v2819_v27  ;;  %v2898_v27 = vld [vmem:[#allocation3 + $0x248] ss:$16 sps:$4 sm:$0xff]  }
  0x68   :  { %1439 = vmatpush1.bf16.msra.mxu1 %v2820_v30  ;;  %v2985_v30 = vld [vmem:[#allocation3 + $0x608] ss:$16 sps:$4 sm:$0xff]  }
  0x69   :  { %1357 = vmatpush1.bf16.msra.mxu0 %v2817_v29  ;;  %1440 = vmatprep.subr.bf16.mxu1 %v2828_v32  ;;  %v2903_v29 = vld [vmem:[#allocation3 + $0x26c] ss:$16 sps:$4 sm:$0xff]  }
  0x6a   :  { %1358 = vmatprep.subr.bf16.mxu0 %v2825_v31  ;;  %v63_v31 = vpack.c.bf16 %v56_v28, %v56_v28  ;;  %v2906_v32 = vld [vmem:[#allocation3 + $0x28c] ss:$16 sps:$4 sm:$0xff]   ;;  %v2949_v28 = vld [vmem:[#allocation3 + $0x468] ss:$16 sps:$4 sm:$0xff]  }
  0x6c   :  { %1441 = vmatpush1.bf16.msra.mxu1 %v2826_v34  ;;  %v2909_v34 = vld [vmem:[#allocation3 + $0x2ac] ss:$16 sps:$4 sm:$0xff]  }
  0x6d   :  { %1359 = vmatpush1.bf16.msra.mxu0 %v2823_v33  ;;  %1442 = vmatprep.subr.bf16.mxu1 %v2834_v36  ;;  %v2904_v33 = vld [vmem:[#allocation3 + $0x288] ss:$16 sps:$4 sm:$0xff]  }
  0x6e   :  { %1360 = vmatprep.subr.bf16.mxu0 %v2831_v35  ;;  %v2912_v35 = vld [vmem:[#allocation3 + $0x2cc] ss:$16 sps:$4 sm:$0xff]   ;;  %v2910_v36 = vld [vmem:[#allocation3 + $0x2c8] ss:$16 sps:$4 sm:$0xff]  }
  0x70   :  { %1443 = vmatpush1.bf16.msra.mxu1 %v2832_v40  ;;  %v2993_v40 = vld [vmem:[%s3569_s3 + $0x4] ss:$8 sps:$4 sm:$0xff]  }
  0x71   :  { %1361 = vmatpush1.bf16.msra.mxu0 %v2829_v39  ;;  %1444 = vmatprep.subr.bf16.mxu1 %v2840_v42  ;;  %v2991_v39 = vld [vmem:[%s3569_s3] ss:$8 sps:$4 sm:$0xff]   ;;  %v2994_v42 = vld [vmem:[%s3569_s3 + $0x10] ss:$8 sps:$4 sm:$0xff]  }
  0x72   :  { %1362 = vmatprep.subr.bf16.mxu0 %v2837_v41  ;;  %v2913_v41 = vld [vmem:[#allocation3 + $0x2e8] ss:$16 sps:$4 sm:$0xff]  }
  0x74   :  { %1445 = vmatpush1.bf16.msra.mxu1 %v2838_v44  ;;  %v2999_v44 = vld [vmem:[%s3569_s3 + $0x24] ss:$8 sps:$4 sm:$0xff]  }
  0x75   :  { %1363 = vmatpush1.bf16.msra.mxu0 %v2835_v43  ;;  %1446 = vmatprep.subr.bf16.mxu1 %v2846_v46  ;;  %v2918_v43 = vld [vmem:[#allocation3 + $0x30c] ss:$16 sps:$4 sm:$0xff]  }
  0x76   :  { %1364 = vmatprep.subr.bf16.mxu0 %v2843_v45  ;;  %v2916_v45 = vld [vmem:[#allocation3 + $0x308] ss:$16 sps:$4 sm:$0xff]  }
  0x77   :  { %v2997_v46 = vld [vmem:[%s3569_s3 + $0x20] ss:$8 sps:$4 sm:$0xff]  }
  0x78   :  { %1447 = vmatpush1.bf16.msra.mxu1 %v2844_v48  ;;  %v3002_v48 = vld [vmem:[%s3569_s3 + $0x34] ss:$8 sps:$4 sm:$0xff]  }
  0x79   :  { %1365 = vmatpush1.bf16.msra.mxu0 %v2841_v47  ;;  %1448 = vmatprep.subr.bf16.mxu1 %v2852_v50  ;;  %v2921_v47 = vld [vmem:[#allocation3 + $0x32c] ss:$16 sps:$4 sm:$0xff]  }
  0x7a   :  { %1366 = vmatprep.subr.bf16.mxu0 %v2849_v49  ;;  %v2919_v49 = vld [vmem:[#allocation3 + $0x328] ss:$16 sps:$4 sm:$0xff]  }
  0x7b   :  { %v3000_v50 = vld [vmem:[%s3569_s3 + $0x30] ss:$8 sps:$4 sm:$0xff]  }
  0x7c   :  { %1449 = vmatpush1.bf16.msra.mxu1 %v2850_v52  ;;  %v3005_v52 = vld [vmem:[%s3569_s3 + $0x44] ss:$8 sps:$4 sm:$0xff]  }
  0x7d   :  { %1367 = vmatpush1.bf16.msra.mxu0 %v2847_v51  ;;  %1450 = vmatprep.subr.bf16.mxu1 %v2858_v55  ;;  %v2924_v51 = vld [vmem:[#allocation3 + $0x34c] ss:$16 sps:$4 sm:$0xff]  }
  0x7e   :  { %1368 = vmatprep.subr.bf16.mxu0 %v2855_v53  ;;  %v2922_v53 = vld [vmem:[#allocation3 + $0x348] ss:$16 sps:$4 sm:$0xff]  }
  0x7f   :  { %v3003_v55 = vld [vmem:[%s3569_s3 + $0x40] ss:$8 sps:$4 sm:$0xff]  }
  0x80   :  { %1451 = vmatpush1.bf16.msra.mxu1 %v2856_v57  ;;  %v3008_v57 = vld [vmem:[%s3569_s3 + $0x54] ss:$8 sps:$4 sm:$0xff]  }
  0x81   :  { %1369 = vmatpush1.bf16.msra.mxu0 %v2853_v56  ;;  %1452 = vmatprep.subr.bf16.mxu1 %v2864_v59  ;;  %v2927_v56 = vld [vmem:[#allocation3 + $0x36c] ss:$16 sps:$4 sm:$0xff]  }
  0x82   :  { %1370 = vmatprep.subr.bf16.mxu0 %v2861_v58  ;;  %v2925_v58 = vld [vmem:[#allocation3 + $0x368] ss:$16 sps:$4 sm:$0xff]  }
  0x83   :  { %v3006_v59 = vld [vmem:[%s3569_s3 + $0x50] ss:$8 sps:$4 sm:$0xff]  }
  0x84   :  { %1453 = vmatpush1.bf16.msra.mxu1 %v2862_v61  ;;  %v3011_v61 = vld [vmem:[%s3569_s3 + $0x64] ss:$8 sps:$4 sm:$0xff]  }
  0x85   :  { %1371 = vmatpush1.bf16.msra.mxu0 %v2859_v60  ;;  %1454 = vmatprep.subr.bf16.mxu1 %v2870_v63  ;;  %v2930_v60 = vld [vmem:[#allocation3 + $0x38c] ss:$16 sps:$4 sm:$0xff]  }
  0x86   :  { %1372 = vmatprep.subr.bf16.mxu0 %v2867_v62  ;;  %v2928_v62 = vld [vmem:[#allocation3 + $0x388] ss:$16 sps:$4 sm:$0xff]  }
  0x87   :  { %v3009_v63 = vld [vmem:[%s3569_s3 + $0x60] ss:$8 sps:$4 sm:$0xff]  }
  0x88   :  { %1455 = vmatpush1.bf16.msra.mxu1 %v2868_v1  ;;  %v3014_v1 = vld [vmem:[%s3569_s3 + $0x74] ss:$8 sps:$4 sm:$0xff]  }
  0x89   :  { %1373 = vmatpush1.bf16.msra.mxu0 %v2865_v0  ;;  %1456 = vmatprep.subr.bf16.mxu1 %v2876_v3  ;;  %v2933_v0 = vld [vmem:[#allocation3 + $0x3ac] ss:$16 sps:$4 sm:$0xff]  }
  0x8a   :  { %1374 = vmatprep.subr.bf16.mxu0 %v2873_v2  ;;  %v2931_v2 = vld [vmem:[#allocation3 + $0x3a8] ss:$16 sps:$4 sm:$0xff]  }
  0x8b   :  { %v3012_v3 = vld [vmem:[%s3569_s3 + $0x70] ss:$8 sps:$4 sm:$0xff]  }
  0x8c   :  { %1457 = vmatpush1.bf16.msra.mxu1 %v2874_v5  ;;  %v3017_v5 = vld [vmem:[%s3569_s3 + $0x84] ss:$8 sps:$4 sm:$0xff]  }
  0x8d   :  { %1375 = vmatpush1.bf16.msra.mxu0 %v2871_v4  ;;  %1458 = vmatprep.subr.bf16.mxu1 %v2882_v7  ;;  %v2936_v4 = vld [vmem:[#allocation3 + $0x3cc] ss:$16 sps:$4 sm:$0xff]  }
  0x8e   :  { %1376 = vmatprep.subr.bf16.mxu0 %v2879_v6  ;;  %v2934_v6 = vld [vmem:[#allocation3 + $0x3c8] ss:$16 sps:$4 sm:$0xff]  }
  0x8f   :  { %v3015_v7 = vld [vmem:[%s3569_s3 + $0x80] ss:$8 sps:$4 sm:$0xff]  }
  0x90   :  { %1459 = vmatpush1.bf16.msra.mxu1 %v2880_v9  ;;  %v3020_v9 = vld [vmem:[%s3569_s3 + $0x94] ss:$8 sps:$4 sm:$0xff]  }
  0x91   :  { %1377 = vmatpush1.bf16.msra.mxu0 %v2877_v8  ;;  %1460 = vmatprep.subr.bf16.mxu1 %v2888_v12  ;;  %v2939_v8 = vld [vmem:[#allocation3 + $0x3ec] ss:$16 sps:$4 sm:$0xff]  }
  0x92   :  { %1378 = vmatprep.subr.bf16.mxu0 %v2885_v11  ;;  %v2937_v11 = vld [vmem:[#allocation3 + $0x3e8] ss:$16 sps:$4 sm:$0xff]  }
  0x93   :  { %v3018_v12 = vld [vmem:[%s3569_s3 + $0x90] ss:$8 sps:$4 sm:$0xff]  }
  0x94   :  { %1461 = vmatpush1.bf16.msra.mxu1 %v2886_v15  ;;  %v3023_v15 = vld [vmem:[%s3569_s3 + $0xa4] ss:$8 sps:$4 sm:$0xff]  }
  0x95   :  { %1379 = vmatpush1.bf16.msra.mxu0 %v2883_v14  ;;  %1471 = vmatprep.subr.bf16.mxu1 %v2891_v17  ;;  %v2942_v14 = vld [vmem:[#allocation3 + $0x40c] ss:$16 sps:$4 sm:$0xff]  }
  0x96   :  { %1389 = vmatprep.subr.bf16.mxu0 %v2897_v18  ;;  %v2945_v17 = vld [vmem:[#allocation3 + $0x42c] ss:$16 sps:$4 sm:$0xff]  }
  0x97   :  { %1463 = vmatmul.mubr.bf16.vlgmr.msra.gmra.mrb[4].mxu1 %v3246_v10  ;;  %v2901_v10 = vld [vmem:[#allocation3 + $0x268] ss:$16 sps:$4 sm:$0xff]  }
  0x98   :  { %1381 = vmatmul.mubr.bf16.vlgmr.msra.gmra.mrb[0].mxu0 %v3262_v20  ;;  %1472 = vmatpush1.bf16.msra.mxu1 %v2889_v21  ;;  %v3021_v18 = vld [vmem:[%s3569_s3 + $0xa0] ss:$8 sps:$4 sm:$0xff]   ;;  %v3026_v21 = vld [vmem:[%s3569_s3 + $0xb4] ss:$8 sps:$4 sm:$0xff]  }
  0x99   :  { %1390 = vmatpush1.bf16.msra.mxu0 %v2895_v22  ;;  %1473 = vmatprep.subr.bf16.mxu1 %v2894_v23  ;;  %v2943_v22 = vld [vmem:[#allocation3 + $0x428] ss:$16 sps:$4 sm:$0xff]   ;;  %v2948_v23 = vld [vmem:[#allocation3 + $0x44c] ss:$16 sps:$4 sm:$0xff]  }
  0x9a   :  { %1421 = vmatprep.mubr.bf16.mxu0 %v3158_v19  ;;  %1503 = vmatprep.mubr.bf16.mxu1 %v3236_v54  ;;  %v2907_v54 = vld [vmem:[#allocation3 + $0x2a8] ss:$16 sps:$4 sm:$0xff]  }
  0x9b   :  { %1553 = vmatprep.subr.bf16.mxu0 %v2987_v24  ;;  %v3024_v24 = vld [vmem:[%s3569_s3 + $0xb0] ss:$8 sps:$4 sm:$0xff]  }
  0x9c   :  { %1474 = vmatpush1.bf16.msra.mxu1 %v2892_v25  ;;  %v3029_v25 = vld [vmem:[%s3569_s3 + $0xc4] ss:$8 sps:$4 sm:$0xff]  }
  0x9d   :  { %1475 = vmatprep.subr.bf16.mxu1 %v2900_v26  ;;  %v2946_v26 = vld [vmem:[#allocation3 + $0x448] ss:$16 sps:$4 sm:$0xff]  }
  0xa0   :  { %1476 = vmatpush1.bf16.msra.mxu1 %v2898_v27  ;;  %v3032_v27 = vld [vmem:[%s3569_s3 + $0xd4] ss:$8 sps:$4 sm:$0xff]  }
  0xa1   :  { %1477 = vmatprep.subr.bf16.mxu1 %v2903_v29  ;;  %v2954_v29 = vld [vmem:[#allocation3 + $0x48c] ss:$16 sps:$4 sm:$0xff]  }
  0xa4   :  { %2546 = vmatmul.mubr.msk.bf16.vlgmr.msra.gmra.mrb[0].mxu0 %vm1262_vm0, %v63_v31  ;;  %1478 = vmatpush1.bf16.msra.mxu1 %v2901_v10  ;;  %v3030_v10 = vld [vmem:[%s3569_s3 + $0xd0] ss:$8 sps:$4 sm:$0xff]  }
  0xa5   :  { %1554 = vmatpush1.bf16.msra.mxu0 %v2985_v30  ;;  %1479 = vmatprep.subr.bf16.mxu1 %v2906_v32  ;;  %v2952_v30 = vld [vmem:[#allocation3 + $0x488] ss:$16 sps:$4 sm:$0xff]  }
  0xa6   :  { %1585 = vmatprep.mubr.bf16.mxu0 %v3158_v19  ;;  %v2996_v19 = vld [vmem:[%s3569_s3 + $0x14] ss:$8 sps:$4 sm:$0xff]   ;;  %2006 = vmatprep.subr.bf16.mxu0 %v2993_v40  ;;  %v3035_v40 = vld [vmem:[%s3569_s3 + $0xe4] ss:$8 sps:$4 sm:$0xff]  }
  0xa7   :  { %v2955_v32 = vld [vmem:[#allocation3 + $0x4a8] ss:$16 sps:$4 sm:$0xff]  }
  0xa8   :  { %1480 = vmatpush1.bf16.msra.mxu1 %v2904_v33  ;;  %v2960_v33 = vld [vmem:[#allocation3 + $0x4cc] ss:$16 sps:$4 sm:$0xff]  }
  0xa9   :  { %1481 = vmatprep.subr.bf16.mxu1 %v2909_v34  ;;  %v2958_v34 = vld [vmem:[#allocation3 + $0x4c8] ss:$16 sps:$4 sm:$0xff]  }
  0xac   :  { %2547 = vmatmul.mubr.msk.bf16.vlgmr.msra.gmra.mrb[4].mxu0 %vm1262_vm0, %v63_v31  ;;  %1482 = vmatpush1.bf16.msra.mxu1 %v2907_v54  ;;  %v2957_v31 = vld [vmem:[#allocation3 + $0x4ac] ss:$16 sps:$4 sm:$0xff]  }
  0xad   :  { %1483 = vmatprep.subr.bf16.mxu1 %v2912_v35  ;;  %2007 = vmatpush1.bf16.msra.mxu0 %v2991_v39  ;;  %v2963_v54 = vld [vmem:[#allocation3 + $0x4ec] ss:$16 sps:$4 sm:$0xff]   ;;  %v2961_v35 = vld [vmem:[#allocation3 + $0x4e8] ss:$16 sps:$4 sm:$0xff]  }
  0xae   :  { %2008 = vmatprep.subr.bf16.mxu0 %v2996_v19  ;;  %v2969_v39 = vld [vmem:[#allocation3 + $0x52c] ss:$16 sps:$4 sm:$0xff]  }
  0xaf   :  { %v3033_v19 = vld [vmem:[%s3569_s3 + $0xe0] ss:$8 sps:$4 sm:$0xff]  }
  0xb0   :  { %1484 = vmatpush1.bf16.msra.mxu1 %v2910_v36  ;;  %v2966_v36 = vld [vmem:[#allocation3 + $0x50c] ss:$16 sps:$4 sm:$0xff]  }
  0xb1   :  { %1485 = vmatprep.subr.bf16.mxu1 %v2915_v37  ;;  %2009 = vmatpush1.bf16.msra.mxu0 %v2994_v42  ;;  %v2964_v37 = vld [vmem:[#allocation3 + $0x508] ss:$16 sps:$4 sm:$0xff]   ;;  %v2972_v42 = vld [vmem:[#allocation3 + $0x54c] ss:$16 sps:$4 sm:$0xff]  }
  0xb2   :  { %2010 = vmatprep.subr.bf16.mxu0 %v2999_v44  ;;  %v3036_v44 = vld [vmem:[%s3569_s3 + $0xf0] ss:$8 sps:$4 sm:$0xff]  }
  0xb4   :  { %1486 = vmatpush1.bf16.msra.mxu1 %v2913_v41  ;;  %v2967_v41 = vld [vmem:[#allocation3 + $0x528] ss:$16 sps:$4 sm:$0xff]  }
  0xb5   :  { %1487 = vmatprep.subr.bf16.mxu1 %v2918_v43  ;;  %2011 = vmatpush1.bf16.msra.mxu0 %v2997_v46  ;;  %v3038_v43 = vld [vmem:[%s3569_s3 + $0xf4] ss:$8 sps:$4 sm:$0xff]  }
  0xb6   :  { %2012 = vmatprep.subr.bf16.mxu0 %v3002_v48  ;;  %v2975_v46 = vld [vmem:[#allocation3 + $0x56c] ss:$16 sps:$4 sm:$0xff]  }
  0xb7   :  { %v3041_v48 = vld [vmem:[%s3569_s3 + $0x104] ss:$8 sps:$4 sm:$0xff]  }
  0xb8   :  { %1488 = vmatpush1.bf16.msra.mxu1 %v2916_v45  ;;  %v2970_v45 = vld [vmem:[#allocation3 + $0x548] ss:$16 sps:$4 sm:$0xff]  }
  0xb9   :  { %1489 = vmatprep.subr.bf16.mxu1 %v2921_v47  ;;  %2013 = vmatpush1.bf16.msra.mxu0 %v3000_v50  ;;  %v2973_v47 = vld [vmem:[#allocation3 + $0x568] ss:$16 sps:$4 sm:$0xff]  }
  0xba   :  { %2014 = vmatprep.subr.bf16.mxu0 %v3005_v52  ;;  %v2976_v50 = vld [vmem:[#allocation3 + $0x588] ss:$16 sps:$4 sm:$0xff]  }
  0xbb   :  { %v2979_v52 = vld [vmem:[#allocation3 + $0x5a8] ss:$16 sps:$4 sm:$0xff]  }
  0xbc   :  { %1490 = vmatpush1.bf16.msra.mxu1 %v2919_v49  ;;  %v2978_v49 = vld [vmem:[#allocation3 + $0x58c] ss:$16 sps:$4 sm:$0xff]  }
  0xbd   :  { %1491 = vmatprep.subr.bf16.mxu1 %v2924_v51  ;;  %2015 = vmatpush1.bf16.msra.mxu0 %v3003_v55  ;;  %v2981_v51 = vld [vmem:[#allocation3 + $0x5ac] ss:$16 sps:$4 sm:$0xff]   ;;  %v2982_v55 = vld [vmem:[#allocation3 + $0x5c8] ss:$16 sps:$4 sm:$0xff]  }
  0xbe   :  { %2016 = vmatprep.subr.bf16.mxu0 %v3008_v57  ;;  %v2988_v57 = vld [vmem:[#allocation3 + $0x5e8] ss:$16 sps:$4 sm:$0xff]  }
  0xc0   :  { %1492 = vmatpush1.bf16.msra.mxu1 %v2922_v53  ;;  %v2984_v53 = vld [vmem:[#allocation3 + $0x5cc] ss:$16 sps:$4 sm:$0xff]  }
  0xc1   :  { %1493 = vmatprep.subr.bf16.mxu1 %v2927_v56  ;;  %2017 = vmatpush1.bf16.msra.mxu0 %v3006_v59  ;;  %v2990_v56 = vld [vmem:[#allocation3 + $0x5ec] ss:$16 sps:$4 sm:$0xff]  }
  0xc2   :  { %2018 = vmatprep.subr.bf16.mxu0 %v3011_v61 }
  0xc4   :  { %1494 = vmatpush1.bf16.msra.mxu1 %v2925_v58 }
  0xc5   :  { %1495 = vmatprep.subr.bf16.mxu1 %v2930_v60  ;;  %2019 = vmatpush1.bf16.msra.mxu0 %v3009_v63 }
  0xc6   :  { %2020 = vmatprep.subr.bf16.mxu0 %v3014_v1  ;;  %v3382_v1 = vld [vmem:[%s3568_s2] sm:$0xf] }
  0xc8   :  { %1496 = vmatpush1.bf16.msra.mxu1 %v2928_v62  ;;  %v262_v62 = vlaneseq }
  0xc9   :  { %1497 = vmatprep.subr.bf16.mxu1 %v2933_v0  ;;  %2021 = vmatpush1.bf16.msra.mxu0 %v3012_v3 }
  0xca   :  { %2022 = vmatprep.subr.bf16.mxu0 %v3017_v5  ;;  %v3374_v63 = vshrl.u32 %v262_v62, 7  ;;  %v3083_v62 = vld [vmem:[%s3569_s3 + $0x1e4] ss:$8 sps:$4 sm:$0xff]  }
  0xcc   :  { %1498 = vmatpush1.bf16.msra.mxu1 %v2931_v2  ;;  %v3377_v0 = vsub.s32 0, %v3374_v63  ;;  %v268_v2 = vsub.s32 1, %v3374_v63 }
  0xcd   :  { %1499 = vmatprep.subr.bf16.mxu1 %v2936_v4  ;;  %2023 = vmatpush1.bf16.msra.mxu0 %v3015_v7  ;;  %v3087_v7 = vld [vmem:[%s3571_s5 + $0x40] sm:$0xff]  }
  0xce   :  { %2024 = vmatprep.subr.bf16.mxu0 %v3020_v9  ;;  %v269_v3 = vrot.slane %v3382_v1, %v268_v2  ;;  %v3089_v9 = vld [vmem:[%s3571_s5 + $0x48] sm:$0xff]  }
  0xd0   :  { %1500 = vmatpush1.bf16.msra.mxu1 %v2934_v6 }
  0xd1   :  { %1501 = vmatprep.subr.bf16.mxu1 %v2939_v8  ;;  %2025 = vmatpush1.bf16.msra.mxu0 %v3018_v12  ;;  %v3088_v8 = vld [vmem:[%s3571_s5] sm:$0xff]  }
  0xd2   :  { %2026 = vmatprep.subr.bf16.mxu0 %v3023_v15 }
  0xd4   :  { %1502 = vmatpush1.bf16.msra.mxu1 %v2937_v11 }
  0xd5   :  { %1512 = vmatprep.subr.bf16.mxu1 %v2942_v14  ;;  %2027 = vmatpush1.bf16.msra.mxu0 %v3021_v18  ;;  %v3090_v18 = vld [vmem:[%s3571_s5 + $0x8] sm:$0xff]  }
  0xd6   :  { %2028 = vmatprep.subr.bf16.mxu0 %v3026_v21 }
  0xd7   :  { %1504 = vmatmul.mubr.bf16.vlgmr.msra.gmra.mrb[4].mxu1 %v3248_v13  ;;  %v2951_v13 = vld [vmem:[#allocation3 + $0x46c] ss:$16 sps:$4 sm:$0xff]  }
  0xd8   :  { %1513 = vmatpush1.bf16.msra.mxu1 %v2940_v16  ;;  %1544 = vmatprep.mubr.bf16.mxu1 %v3256_v38  ;;  %v3027_v38 = vld [vmem:[%s3569_s3 + $0xc0] ss:$8 sps:$4 sm:$0xff]  }
  0xd9   :  { %1514 = vmatprep.subr.bf16.mxu1 %v2945_v17  ;;  %2029 = vmatpush1.bf16.msra.mxu0 %v3024_v24 }
  0xda   :  { %2030 = vmatprep.subr.bf16.mxu0 %v3029_v25 }
  0xdc   :  { %1515 = vmatpush1.bf16.msra.mxu1 %v2943_v22  ;;  %v3091_v22 = vld [vmem:[%s3571_s5 + $0x50] sm:$0xff]  }
  0xdd   :  { %1516 = vmatprep.subr.bf16.mxu1 %v2948_v23  ;;  %2031 = vmatpush1.bf16.msra.mxu0 %v3027_v38 }
  0xde   :  { %2032 = vmatprep.subr.bf16.mxu0 %v3032_v27  ;;  %v3044_v27 = vld [vmem:[%s3569_s3 + $0x114] ss:$8 sps:$4 sm:$0xff]  }
  0xe0   :  { %1517 = vmatpush1.bf16.msra.mxu1 %v2946_v26  ;;  %v3039_v26 = vld [vmem:[%s3569_s3 + $0x100] ss:$8 sps:$4 sm:$0xff]  }
  0xe1   :  { %1518 = vmatprep.subr.bf16.mxu1 %v2951_v13  ;;  %2033 = vmatpush1.bf16.msra.mxu0 %v3030_v10  ;;  %v3092_v13 = vld [vmem:[%s3571_s5 + $0x10] sm:$0xff]  }
  0xe2   :  { %2034 = vmatprep.subr.bf16.mxu0 %v3035_v40  ;;  %v3048_v40 = vld [vmem:[%s3569_s3 + $0x130] ss:$8 sps:$4 sm:$0xff]  }
  0xe4   :  { %1519 = vmatpush1.bf16.msra.mxu1 %v2949_v28 }
  0xe5   :  { %1520 = vmatprep.subr.bf16.mxu1 %v2954_v29  ;;  %2035 = vmatpush1.bf16.msra.mxu0 %v3033_v19  ;;  %v3093_v29 = vld [vmem:[%s3571_s5 + $0x58] sm:$0xff]   ;;  %v3098_v19 = vld [vmem:[%s3571_s5 + $0x28] sm:$0xff]  }
  0xe6   :  { %2036 = vmatprep.subr.bf16.mxu0 %v3038_v43  ;;  %v3056_v43 = vld [vmem:[%s3569_s3 + $0x154] ss:$8 sps:$4 sm:$0xff]  }
  0xe8   :  { %1521 = vmatpush1.bf16.msra.mxu1 %v2952_v30 }
  0xe9   :  { %1522 = vmatprep.subr.bf16.mxu1 %v2957_v31  ;;  %2037 = vmatpush1.bf16.msra.mxu0 %v3036_v44  ;;  %v3042_v31 = vld [vmem:[%s3569_s3 + $0x110] ss:$8 sps:$4 sm:$0xff]  }
  0xea   :  { %2047 = vmatprep.subr.bf16.mxu0 %v3041_v48  ;;  %v3054_v44 = vld [vmem:[%s3569_s3 + $0x150] ss:$8 sps:$4 sm:$0xff]  }
  0xeb   :  { %v3060_v48 = vld [vmem:[%s3569_s3 + $0x170] ss:$8 sps:$4 sm:$0xff]  }
  0xec   :  { %1523 = vmatpush1.bf16.msra.mxu1 %v2955_v32 }
  0xed   :  { %1524 = vmatprep.subr.bf16.mxu1 %v2960_v33  ;;  %v3094_v33 = vld [vmem:[%s3571_s5 + $0x18] sm:$0xff]  }
  0xf0   :  { %1525 = vmatpush1.bf16.msra.mxu1 %v2958_v34  ;;  %v3047_v34 = vld [vmem:[%s3569_s3 + $0x124] ss:$8 sps:$4 sm:$0xff]  }
  0xf1   :  { %1526 = vmatprep.subr.bf16.mxu1 %v2963_v54  ;;  %v3095_v54 = vld [vmem:[%s3571_s5 + $0x60] sm:$0xff]  }
  0xf4   :  { %1527 = vmatpush1.bf16.msra.mxu1 %v2961_v35  ;;  %v3045_v35 = vld [vmem:[%s3569_s3 + $0x120] ss:$8 sps:$4 sm:$0xff]  }
  0xf5   :  { %1528 = vmatprep.subr.bf16.mxu1 %v2966_v36  ;;  %v3096_v36 = vld [vmem:[%s3571_s5 + $0x20] sm:$0xff]  }
  0xf8   :  { %1529 = vmatpush1.bf16.msra.mxu1 %v2964_v37  ;;  %v3050_v37 = vld [vmem:[%s3569_s3 + $0x134] ss:$8 sps:$4 sm:$0xff]  }
  0xf9   :  { %1530 = vmatprep.subr.bf16.mxu1 %v2969_v39  ;;  %v3097_v39 = vld [vmem:[%s3571_s5 + $0x68] sm:$0xff]  }
  0xfc   :  { %1531 = vmatpush1.bf16.msra.mxu1 %v2967_v41  ;;  %v3053_v41 = vld [vmem:[%s3569_s3 + $0x144] ss:$8 sps:$4 sm:$0xff]  }
  0xfd   :  { %1532 = vmatprep.subr.bf16.mxu1 %v2972_v42  ;;  %v3051_v42 = vld [vmem:[%s3569_s3 + $0x140] ss:$8 sps:$4 sm:$0xff]  }
 0x100   :  { %1533 = vmatpush1.bf16.msra.mxu1 %v2970_v45  ;;  %v3059_v45 = vld [vmem:[%s3569_s3 + $0x164] ss:$8 sps:$4 sm:$0xff]  }
 0x101   :  { %1534 = vmatprep.subr.bf16.mxu1 %v2975_v46  ;;  %v3057_v46 = vld [vmem:[%s3569_s3 + $0x160] ss:$8 sps:$4 sm:$0xff]  }
 0x104   :  { %1535 = vmatpush1.bf16.msra.mxu1 %v2973_v47  ;;  %v3062_v47 = vld [vmem:[%s3569_s3 + $0x174] ss:$8 sps:$4 sm:$0xff]  }
 0x105   :  { %1536 = vmatprep.subr.bf16.mxu1 %v2978_v49  ;;  %v3065_v49 = vld [vmem:[%s3569_s3 + $0x184] ss:$8 sps:$4 sm:$0xff]  }
 0x108   :  { %1537 = vmatpush1.bf16.msra.mxu1 %v2976_v50  ;;  %v3063_v50 = vld [vmem:[%s3569_s3 + $0x180] ss:$8 sps:$4 sm:$0xff]  }
 0x109   :  { %1538 = vmatprep.subr.bf16.mxu1 %v2981_v51  ;;  %v3068_v51 = vld [vmem:[%s3569_s3 + $0x194] ss:$8 sps:$4 sm:$0xff]  }
 0x10c   :  { %1539 = vmatpush1.bf16.msra.mxu1 %v2979_v52  ;;  %v3066_v52 = vld [vmem:[%s3569_s3 + $0x190] ss:$8 sps:$4 sm:$0xff]  }
 0x10d   :  { %1540 = vmatprep.subr.bf16.mxu1 %v2984_v53  ;;  %v3071_v53 = vld [vmem:[%s3569_s3 + $0x1a4] ss:$8 sps:$4 sm:$0xff]  }
 0x110   :  { %1541 = vmatpush1.bf16.msra.mxu1 %v2982_v55  ;;  %v3069_v55 = vld [vmem:[%s3569_s3 + $0x1a0] ss:$8 sps:$4 sm:$0xff]  }
 0x111   :  { %1542 = vmatprep.subr.bf16.mxu1 %v2990_v56  ;;  %v3074_v56 = vld [vmem:[%s3569_s3 + $0x1b4] ss:$8 sps:$4 sm:$0xff]  }
 0x114   :  { %1543 = vmatpush1.bf16.msra.mxu1 %v2988_v57  ;;  %v3072_v57 = vld [vmem:[%s3569_s3 + $0x1b0] ss:$8 sps:$4 sm:$0xff]  }
 0x115   :  { %2629 = vmatprep.subr.bf16.mxu1 %v3087_v7 }
 0x117   :  { %1545 = vmatmul.mubr.bf16.vlgmr.msra.gmra.mrb[4].mxu1 %v3262_v20  ;;  %v265_v20 = vrot.slane %v3382_v1, %v3377_v0 }
 0x118   :  { %2630 = vmatpush3.bf16.msra.mxu1 %v3088_v8 }
 0x119   :  { %2631 = vmatprep.subr.bf16.mxu1 %v3089_v9 }
 0x11c   :  { %2632 = vmatpush3.bf16.msra.mxu1 %v3090_v18 }
 0x11d   :  { %2633 = vmatprep.subr.bf16.mxu1 %v3091_v22 }
 0x120   :  { %2634 = vmatpush3.bf16.msra.mxu1 %v3092_v13  ;;  %v3100_v13 = vld [vmem:[%s3571_s5 + $0x30] sm:$0xff]  }
 0x121   :  { %2635 = vmatprep.subr.bf16.mxu1 %v3093_v29 }
 0x124   :  { %2636 = vmatpush3.bf16.msra.mxu1 %v3094_v33 }
 0x125   :  { %2637 = vmatprep.subr.bf16.mxu1 %v3095_v54 }
 0x128   :  { %2638 = vmatpush3.bf16.msra.mxu1 %v3096_v36 }
 0x129   :  { %2639 = vmatprep.subr.bf16.mxu1 %v3097_v39 }
 0x12a   :  { %v1300_v58 = vpop.f32.mrb[0].mxu1 }
 0x12b   :  { %v1302_v59 = vpop.f32.mrb[1].mxu1  ;;  %v1301_v4 = vadd.f32 %v1300_v58, %v265_v20  ;;  %v3077_v58 = vld [vmem:[%s3569_s3 + $0x1c4] ss:$8 sps:$4 sm:$0xff]   ;;  %v3081_v20 = vld [vmem:[%s3569_s3 + $0x1e0] ss:$8 sps:$4 sm:$0xff]  }
 0x12c   :  { %v1304_v60 = vpop.f32.mrb[2].mxu1  ;;  %v1303_v5 = vadd.f32 %v1302_v59, %v269_v3  ;;  %2640 = vmatpush3.bf16.msra.mxu1 %v3098_v19  ;;  %v3075_v59 = vld [vmem:[%s3569_s3 + $0x1c0] ss:$8 sps:$4 sm:$0xff]   ;;  %v3086_v3 = vld [vmem:[%s3569_s3 + $0x1f4] ss:$8 sps:$4 sm:$0xff]  }
 0x12d   :  { %v1305_v61 = vpop.f32.mrb[3].mxu1  ;;  %v3080_v60 = vld [vmem:[%s3569_s3 + $0x1d4] ss:$8 sps:$4 sm:$0xff]  }
 0x12e   :  { %v3078_v61 = vld [vmem:[%s3569_s3 + $0x1d0] ss:$8 sps:$4 sm:$0xff]  }
 0x177   :  { %v1423_v6 = vpop.f32.mrb[0].mxu0 }
 0x178   :  { %v2660_v11 = vadd.f32 %v1423_v6, %v1301_v4  ;;  %v1425_v12 = vpop.f32.mrb[1].mxu0  ;;  %v3084_v4 = vld [vmem:[%s3569_s3 + $0x1f0] ss:$8 sps:$4 sm:$0xff]   ;;  %v276_v6 = vsub.s32 3, %v3374_v63 }
 0x179   :  { %v2662_v14 = vadd.f32 %v1425_v12, %v1303_v5  ;;  %v1427_v15 = vpop.f32.mrb[2].mxu0  ;;  %v272_v5 = vsub.s32 2, %v3374_v63  ;;  %v2316_v63 = vld [vmem:[#allocation2] sm:$0x1] }
 0x17a   :  { %vm1594_vm1 = vcmp.gt.f32.partialorder %v2660_v11, 0.0  ;;  %v1598_v16 = vmul.f32 0.2, %v2660_v11  ;;  %v1428_v17 = vpop.f32.mrb[3].mxu0  ;;  %v277_v8 = vrot.slane %v3382_v1, %v276_v6  ;;  %2319 = vperm.xlu0 %2696, %v2316_v63  }
 0x17b   :  { %vm1595_vm2 = vcmp.gt.f32.partialorder %v2662_v14, 0.0  ;;  %v1599_v21 = vmul.f32 0.2, %v2662_v14  ;;  %v273_v7 = vrot.slane %v3382_v1, %v272_v5  ;;  %v3099_v1 = vld [vmem:[%s3571_s5 + $0x70] sm:$0xff]  }
 0x17c   :  { %v1602_v23 = vsel %vm1594_vm1, %v2660_v11, %v1598_v16  ;;  %2641 = vmatprep.subr.bf16.mxu1 %v3099_v1 }
 0x17d   :  { %v1603_v24 = vsel %vm1595_vm2, %v2662_v14, %v1599_v21  ;;  %v1606_v38 = vpack.c.bf16 %v1602_v23, %v1602_v23  ;;  %2642 = vmatpush3.bf16.msra.mxu1 %v3100_v13 }
 0x17e   :  { %v1607_v25 = vpack.c.bf16 %v1603_v24, %v1603_v24 }
 0x17f   :  { %v3414_v28 = vpop.f32.mrb[4].mxu0 }
 0x180   :  { %2038 = vmatprep.mubr.bf16.mxu0 %v1607_v25  ;;  %v3419_v10 = vpop.f32.mrb[5].mxu0 }
 0x181   :  { %2039 = vmatmul.mubr.bf16.vlgmr.msra.gmra.mrb[8].mxu0 %v1606_v38  ;;  %v1591_v30 = vpop.f32.mrb[6].mxu0  ;;  %v3101_v38 = vld [vmem:[%s3571_s5 + $0x78] sm:$0xff]  }
 0x182   :  { %2048 = vmatpush1.bf16.msra.mxu0 %v3039_v26  ;;  %v1592_v32 = vpop.f32.mrb[7].mxu0  ;;  %2643 = vmatprep.subr.bf16.mxu1 %v3101_v38 }
 0x183   :  { %2049 = vmatprep.subr.bf16.mxu0 %v3044_v27  ;;  %v3102_v27 = vld [vmem:[%s3571_s5 + $0x38] sm:$0xff]  }
 0x184   :  { %2644 = vmatpush3.bf16.msra.mxu1 %v3102_v27 }
 0x186   :  { %2050 = vmatpush1.bf16.msra.mxu0 %v3042_v31 }
 0x187   :  { %2051 = vmatprep.subr.bf16.mxu0 %v3047_v34 }
 0x18a   :  { %2052 = vmatpush1.bf16.msra.mxu0 %v3045_v35 }
 0x18b   :  { %2053 = vmatprep.subr.bf16.mxu0 %v3050_v37 }
 0x18e   :  { %2054 = vmatpush1.bf16.msra.mxu0 %v3048_v40 }
 0x18f   :  { %2055 = vmatprep.subr.bf16.mxu0 %v3053_v41  ;;  %v3159_v41 = vmov 0.0  }
 0x192   :  { %2056 = vmatpush1.bf16.msra.mxu0 %v3051_v42  ;;  %v2612_v42 = vld [vmem:[%s3572_s6] ss:$0 sm:$0xff]  ;;  %s3161_s6 = smov [#allocation6]  }
 0x193   :  { %2057 = vmatprep.subr.bf16.mxu0 %v3056_v43  ;;  %s2341_s30 = sshll.u32 %s3161_s6, 4  ;;  %s2342_s30 = int_to_ptr.vmem [resolvable:$true] %s2341_s30 }
 0x194   :  { %s3133_s10 = scalar_lea.vmem %s2342_s30, 32  ;;  %p3134_p9 = scmp.lt.s32.totalorder %s2342_s30, %s2342_s30 }
 0x196   :  { %2058 = vmatpush1.bf16.msra.mxu0 %v3054_v44 }
 0x197   :  { %2059 = vmatprep.subr.bf16.mxu0 %v3059_v45 }
 0x19a   :  { %2060 = vmatpush1.bf16.msra.mxu0 %v3057_v46 }
 0x19b   :  { %2061 = vmatprep.subr.bf16.mxu0 %v3062_v47 }
 0x19e   :  { %2062 = vmatpush1.bf16.msra.mxu0 %v3060_v48 }
 0x19f   :  { %2063 = vmatprep.subr.bf16.mxu0 %v3065_v49 }
 0x1a2   :  { %2064 = vmatpush1.bf16.msra.mxu0 %v3063_v50 }
 0x1a3   :  { %2065 = vmatprep.subr.bf16.mxu0 %v3068_v51  ;;  %v2274_v51 = vld [vmem:[%s3573_s7] sm:$0xf]  ;;  %s3129_s7 = scalar_lea.vmem %s2342_s30, 16 }
 0x1a4   :  { %p3130_p8 = scmp.ne.s32.totalorder %s2342_s30, %s3129_s7  ;;  %p3135_p10 = scmp.lt.s32.totalorder %s3133_s10, %s3129_s7 }
 0x1a6   :  { %2066 = vmatpush1.bf16.msra.mxu0 %v3066_v52  ;;  %p3136_p11 = por %p3135_p10, %p3134_p9 }
 0x1a7   :  { %2067 = vmatprep.subr.bf16.mxu0 %v3071_v53 }
 0x1a8   :  { %p3137_p12 = pnand %p3136_p11, %p3130_p8 }
 0x1aa   :  { %2068 = vmatpush1.bf16.msra.mxu0 %v3069_v55 }
 0x1ab   :  { %2069 = vmatprep.subr.bf16.mxu0 %v3074_v56 }
 0x1ae   :  { %2070 = vmatpush1.bf16.msra.mxu0 %v3072_v57 }
 0x1af   :  { %2071 = vmatprep.subr.bf16.mxu0 %v3077_v58 }
 0x1b2   :  { %2072 = vmatpush1.bf16.msra.mxu0 %v3075_v59 }
 0x1b3   :  { %2073 = vmatprep.subr.bf16.mxu0 %v3080_v60 }
 0x1b6   :  { %2074 = vmatpush1.bf16.msra.mxu0 %v3078_v61 }
 0x1b7   :  { %2075 = vmatprep.subr.bf16.mxu0 %v3083_v62 }
 0x1ba   :  { %2076 = vmatpush1.bf16.msra.mxu0 %v3081_v20 }
 0x1bb   :  { %2077 = vmatprep.subr.bf16.mxu0 %v3086_v3 }
 0x1be   :  { %2078 = vmatpush1.bf16.msra.mxu0 %v3084_v4 }
 0x1bf   :  { %2653 = vmatprep.subr.bf16.mxu0 %v3159_v41 }
 0x1ea   :  { %v1546_v9 = vpop.f32.mrb[4].mxu1 }
 0x1eb   :  { %v2663_v11 = vadd.f32 %v1546_v9, %v273_v7  ;;  %v1548_v12 = vpop.f32.mrb[5].mxu1 }
 0x1ec   :  { %v2665_v14 = vadd.f32 %v1548_v12, %v277_v8  ;;  %v1550_v15 = vpop.f32.mrb[6].mxu1 }
 0x1ed   :  { %v2664_v16 = vadd.f32 %v2663_v11, %v3414_v28  ;;  %v1551_v17 = vpop.f32.mrb[7].mxu1  ;;  %v1674_v28 = vld [vmem:[%s3570_s4] sm:$0x3] }
 0x1ee   :  { %v2666_v18 = vadd.f32 %v2665_v14, %v3419_v10  ;;  %v1679_v29 = vrot.slane %v1674_v28, %v3377_v0  ;;  %v1683_v10 = vrot.slane %v1674_v28, %v268_v2 }
 0x1ef   :  { %vm1596_vm3 = vcmp.gt.f32.partialorder %v2664_v16, 0.0  ;;  %v1600_v21 = vmul.f32 0.2, %v2664_v16 }
 0x1f0   :  { %v1601_v22 = vmul.f32 0.2, %v2666_v18  ;;  %vm1597_vm4 = vcmp.gt.f32.partialorder %v2666_v18, 0.0 }
 0x1f1   :  { %v1604_v23 = vsel %vm1596_vm3, %v2664_v16, %v1600_v21 }
 0x1f2   :  { %v1605_v24 = vsel %vm1597_vm4, %v2666_v18, %v1601_v22  ;;  %v1608_v26 = vpack.c.bf16 %v1604_v23, %v1604_v23 }
 0x1f3   :  { %v1609_v25 = vpack.c.bf16 %v1605_v24, %v1605_v24 }
 0x1f5   :  { %2079 = vmatprep.mubr.bf16.mxu0 %v1609_v25 }
 0x1f6   :  { %2080 = vmatmul.mubr.bf16.vlgmr.msra.gmra.mrb[8].mxu0 %v1608_v26 }
 0x1f7   :  { %2655 = vmatprep.mubr.msk.bf16.mxu0 %vm3160_vm7, %v3159_v41 }
 0x1f9   :  { %v2320_v52 = vpop.permute.xlu0 %2319 }
 0x1fa   :  { %v2325_v53 = vrot.slane %v2320_v52, %v3377_v0 }
 0x2c9   :  { %v2081_v30 = vpop.f32.mrb[8].mxu0 }
 0x2ca   :  { %v2667_v31 = vadd.f32 %v2081_v30, %v1679_v29  ;;  %v2083_v32 = vpop.f32.mrb[9].mxu0 }
 0x2cb   :  { %v2668_v33 = vadd.f32 %v2083_v32, %v1683_v10  ;;  %v2085_v34 = vpop.f32.mrb[10].mxu0 }
 0x2cc   :  { %vm2088_vm5 = vcmp.gt.f32.partialorder %v2667_v31, 0.0  ;;  %v2090_v54 = vmul.f32 0.2, %v2667_v31  ;;  %v2086_v35 = vpop.f32.mrb[11].mxu0 }
 0x2cd   :  { %vm2089_vm6 = vcmp.gt.f32.partialorder %v2668_v33, 0.0  ;;  %v2091_v36 = vmul.f32 0.2, %v2668_v33 }
 0x2ce   :  { %v2092_v37 = vsel %vm2088_vm5, %v2667_v31, %v2090_v54 }
 0x2cf   :  { %v2093_v39 = vsel %vm2089_vm6, %v2668_v33, %v2091_v36  ;;  %v2094_v19 = vpack.c.bf16 %v2092_v37, %v2092_v37 }
 0x2d0   :  { %v2095_v40 = vpack.c.bf16 %v2093_v39, %v2093_v39 }
 0x2d2   :  { %2263 = vmatprep.mubr.bf16.mxu1 %v2095_v40 }
 0x2d3   :  { %2264 = vmatmul.mubr.bf16.vlgmr.msra.gmra.mrb[8].mxu1 %v2094_v19 }
 0x3a6   :  { %v2645_v2 = vpop.f32.mrb[8].mxu1 }
 0x3a7   :  { %v2646_v43 = vpop.f32.mrb[9].mxu1 }
 0x3a8   :  { %v2647_v44 = vadd.f32 %v2646_v43, %v2645_v2  ;;  %v2648_v45 = vpop.f32.mrb[10].mxu1 }
 0x3a9   :  { %v2649_v46 = vpop.f32.mrb[11].mxu1 }
 0x3aa   :  { %v2266_v47 = vadd.f32 %v2647_v44, %v2612_v42 }
 0x3ac   :  { %vm2271_vm8 = vcmp.gt.f32.partialorder %v2266_v47, 0.0  ;;  %v2272_v48 = vmul.f32 0.2, %v2266_v47 }
 0x3ae   :  { %v2273_v49 = vsel %vm2271_vm8, %v2266_v47, %v2272_v48 }
 0x3af   :  { %v2275_v50 = vpack.c.bf16 %v2273_v49, %v2273_v49 }
 0x3b1   :  { %2654 = vmatpush3.bf16.xpose.msra.mxu0 %v2275_v50 }
 0x3b8   :  { %2656 = vmatmul.mubr.bf16.vlgmr.msra.gmra.mrb[12].mxu0 %v2274_v51 }
 0x48b   :  { %v2310_v55 = vpop.f32.mrb[12].mxu0 }
 0x48c   :  { %v2326_v56 = vadd.f32 %v2325_v53, %v2310_v55  ;;  %v2657_v57 = vpop.f32.mrb[13].mxu0 }
 0x48d   :  { %v2313_v58 = vpop.f32.mrb[14].mxu0 }
 0x48e   :  { %v2327_v59 = vsub.f32 0.0, %v2326_v56  ;;  %v2658_v60 = vpop.f32.mrb[15].mxu0 }
 0x490   :  { %v2328_v61 = vmul.f32 1.442695, %v2327_v59 }
 0x492   :  { %3103 = vpow2.f32 %v2328_v61 }
 0x49c   :  { %v3104_v62 = vpop.eup %3103 }
 0x49d   :  { %v2330_v20 = vadd.f32 1.0, %v3104_v62 }
 0x49f   :  { %3105 = vrcp.f32 %v2330_v20 }
 0x4a9   :  { %v3106_v3 = vpop.eup %3105 }
 0x4aa   :  { %2334 = vst.msk [vmem:[#allocation6] sm:$0x1] %vm2333_vm9, %v3106_v3 }
 0x4ab   :  { %3140 = shalt.err (!%p3137_p12)
}
 0x4ac   :  { %s3141_s13 = scalar_lea.hbm %s3575_s9, 16 }
 0x4ad   :  { %p3142_p13 = scmp.ne.s32.totalorder %s3575_s9, %s3141_s13  ;;  %p3145_p0 = scmp.lt.u32.totalorder %s3141_s13, %s3575_s9 }
 0x4af   :  { %p3147_p1 = pnand %p3145_p0, %p3142_p13 }
 0x4b1   :  { %3150 = shalt.err (!%p3147_p1)
}
 0x4b2   :  { %2344 = dma.vmem_to_hbm [thread:$0]  %s2342_s30, 16, %s3575_s9, [#allocation5]  }
 0x4b3   :  { %3153 = dma.done.wait [#allocation5], 16  }
 0x4b4   :  { %3154 = vsyncadd [#allocation5], 4294967280 }
 0x4b5   :  { %2348 = vsyncpa [#allocation4], 1 }
 0x4b6   :  { %2349 = vsyncpa [#allocation5], 1 }

</bundles_post_ra>
